<compile_context>
chip_gen: v5e
topology: v5e:2x2
jax: 0.10.0
libtpu: 0.0.40
codegen_flags: <defaults>
</compile_context>

<pallas_src>
import functools

import jax
import jax.numpy as jnp
import numpy as np
from jax.experimental import pallas as pl
from jax.experimental.pallas import tpu as pltpu


def _round_up(x, m):
    return ((x + m - 1) // m) * m


def classifier_kernel(x_ref, wc_ref, shift_ref, pool_ref, wfc_ref, bfc_ref,
                      out_ref, *, epilogue_dtype):
    # x_ref:     (Bn*HW, Cin)  bf16/f32  row tile (Bn batch elements' pixels)
    # wc_ref:    (Cin, Cout)   bf16      1x1 conv weight with BN scale folded
    # shift_ref: (1, Cout)     epilogue  folded BN shift = beta - mean*scale
    # pool_ref:  (Bn, Bn*HW)   bf16      block-diagonal 0/1 pooling matrix
    # wfc_ref:   (Cout, NCp)   bf16      fc weight^T * (1/HW), lane-padded
    # bfc_ref:   (1, NCp)      f32       fc bias, lane-padded
    # out_ref:   (Bn, NCp)     f32       logits tile (lane-dense)
    x = x_ref[...]
    if x.dtype != jnp.bfloat16:
        x = x.astype(jnp.bfloat16)

    # 1x1 conv (+ folded BN scale) == channel matmul on the MXU, f32 accumulate.
    h = jnp.dot(x, wc_ref[...], preferred_element_type=jnp.float32)  # (rows, Cout)

    # BN shift + MemoryEfficientSwish, in the per-generation epilogue dtype.
    a = h.astype(epilogue_dtype) + shift_ref[...]
    a = a * jax.nn.sigmoid(a)

    # AdaptiveAvgPool2d(1): per-element spatial SUM as an MXU matmul with an
    # exact 0/1 block-diagonal matrix; the 1/HW factor lives in wfc.
    pooled = jnp.dot(pool_ref[...], a.astype(jnp.bfloat16),
                     preferred_element_type=jnp.float32)             # (Bn, Cout)

    # TODO(synk): Dropout is identity here (eval/inference semantics); no RNG.

    # fc: Linear(Cout, num_classes) over the whole tile (bf16 MXU, f32 acc).
    out_ref[...] = (jnp.dot(pooled.astype(jnp.bfloat16), wfc_ref[...],
                            preferred_element_type=jnp.float32)
                    + bfc_ref[...])


def _tile_vmem_bytes(Bn, HW, Cin, Cout, NCp, x_bytes, epi_bytes):
    rows = Bn * HW
    return int(
        2 * rows * Cin * x_bytes              # x tile (double-buffered)
        + Cin * Cout * 2                      # conv weight (bf16, single buf)
        + Cout * epi_bytes                    # BN shift
        + Bn * rows * 2                       # pooling matrix (bf16, single)
        + Cout * NCp * 2 + NCp * 4            # fc weight (bf16) + bias (f32)
        + 2 * Bn * NCp * 4                    # logits tile (double-buffered)
        + rows * Cout * (4 + epi_bytes + 2))  # conv acc + swish + bf16 copy


def _pick_batch_tile(N, HW, Cin, Cout, NCp, x_bytes, epi_bytes, budget):
    # Bn multiple of 16 when HW is odd keeps rows = Bn*HW a multiple of 16
    # (bf16 sublane packing); a multiple of 8 is always required so the f32
    # out tile / x tile sublane dims obey the (8, 128) rule.
    step = 16 if HW % 2 else 8
    cap = _round_up(N, step)
    if N >= 2 * step:                         # keep >= 2 grid steps (v7x TCs)
        cap = _round_up((N + 1) // 2, step)
    best, bn = step, step
    while bn <= cap:
        if _tile_vmem_bytes(bn, HW, Cin, Cout, NCp, x_bytes, epi_bytes) <= budget:
            best = bn
        bn += step
    return best


def _default_epilogue_dtype():
    # v6e/v7x have bf16 VPU/EUP paths and the sigmoid is the binding slot at
    # real Cout~1280; v5e (and older) do not, so keep the epilogue in f32.
    try:
        kind = jax.devices()[0].device_kind.lower()
    except Exception:
        return jnp.bfloat16
    return jnp.bfloat16 if ("v6" in kind or "v7" in kind) else jnp.float32


def _const_spec(shape, index_map):
    # Constant-index blocks gain nothing from double buffering; request a
    # single buffer to halve their VMEM footprint.  Fall back gracefully if
    # the installed jax does not expose pipeline_mode / Buffered.
    try:
        return pl.BlockSpec(shape, index_map, pipeline_mode=pl.Buffered(1))
    except (TypeError, AttributeError):
        return pl.BlockSpec(shape, index_map)


def classifier_forward(x, conv_w, bn_gamma, bn_beta, bn_mean, bn_var, bn_eps,
                       fc_w, fc_b, *, batch_tile=None, channels_last=False,
                       epilogue_dtype=None, vmem_budget_bytes=40 << 20):
    """Classifier head forward.

    x: (N, Cin, H, W) if channels_last=False (PyTorch NCHW), else (N, H, W, Cin).
    Returns logits (N, num_classes).
    """
    if channels_last:
        N, H, W, Cin = x.shape
    else:
        N, Cin, H, W = x.shape
    Cout = conv_w.shape[0]
    NC = fc_w.shape[0]
    HW = H * W
    NCp = _round_up(NC, 128)                  # lane-dense logits slab

    if epilogue_dtype is None:
        epilogue_dtype = _default_epilogue_dtype()
    epi_bytes = jnp.dtype(epilogue_dtype).itemsize

    # glue: x -> (N, HW, Cin) row-major.  NCHW input needs one fused
    # transpose + bf16-cast HBM pass; channels_last input is a free reshape
    # (the kernel casts to bf16 on-chip instead).
    if channels_last:
        x3 = x.reshape(N, HW, Cin)
        x_bytes = jnp.dtype(x3.dtype).itemsize
    else:
        x3 = jnp.transpose(x, (0, 2, 3, 1)).reshape(N, HW, Cin)
        x3 = x3.astype(jnp.bfloat16)
        x_bytes = 2

    if batch_tile is None:
        Bn = _pick_batch_tile(N, HW, Cin, Cout, NCp, x_bytes, epi_bytes,
                              vmem_budget_bytes)
    else:
        Bn = max(8, _round_up(batch_tile, 8))
    n_tiles = pl.cdiv(N, Bn)
    N_pad = n_tiles * Bn
    rows = Bn * HW                            # rows per grid step

    if N_pad != N:
        x3 = jnp.concatenate(
            [x3, jnp.zeros((N_pad - N, HW, Cin), x3.dtype)], axis=0)
    x2 = x3.reshape(N_pad * HW, Cin)

    # Fold BN: scale into the conv weight (f32 multiply before the single bf16
    # cast), shift kept in the epilogue dtype.
    scale_v = (bn_gamma.astype(jnp.float32)
               / jnp.sqrt(bn_var.astype(jnp.float32) + bn_eps))
    shift = (bn_beta.astype(jnp.float32)
             - bn_mean.astype(jnp.float32) * scale_v).reshape(1, Cout)
    shift = shift.astype(epilogue_dtype)
    wc = (jnp.transpose(conv_w.reshape(Cout, Cin), (1, 0)).astype(jnp.float32)
          * scale_v[None, :]).astype(jnp.bfloat16)                   # (Cin, Cout)

    # Exact 0/1 block-diagonal pooling matrix: row b sums cols [b*HW,(b+1)*HW).
    pool = jnp.repeat(jnp.eye(Bn, dtype=jnp.bfloat16), HW, axis=1)   # (Bn, rows)

    # fc weight (NC, Cout) -> (Cout, NCp), 1/HW folded in f32, then bf16.
    wfc = jnp.zeros((Cout, NCp), jnp.float32).at[:, :NC].set(
        jnp.transpose(fc_w, (1, 0)).astype(jnp.float32) * (1.0 / HW))
    wfc = wfc.astype(jnp.bfloat16)
    bfc = jnp.zeros((1, NCp), jnp.float32).at[0, :NC].set(
        fc_b.astype(jnp.float32))

    # advisory cost estimate for XLA scheduling.
    flops = int(2 * N_pad * HW * Cin * Cout            # conv matmul
                + 2 * N_pad * HW * Bn * Cout           # pooling matmul
                + 2 * N_pad * Cout * NCp)              # fc matmul
    transcendentals = int(N_pad * HW * Cout)           # sigmoid
    bytes_accessed = int(x2.size * x_bytes + wc.size * 2 + pool.size * 2
                         + shift.size * epi_bytes + wfc.size * 2
                         + bfc.size * 4 + N_pad * NCp * 4)

    vmem_est = _tile_vmem_bytes(Bn, HW, Cin, Cout, NCp, x_bytes, epi_bytes)
    vmem_limit = int(min(64 << 20,
                         max(32 << 20, int(vmem_est * 1.5) + (4 << 20))))

    kernel = functools.partial(classifier_kernel, epilogue_dtype=epilogue_dtype)

    out = pl.pallas_call(
        kernel,
        out_shape=jax.ShapeDtypeStruct((N_pad, NCp), jnp.float32),
        grid_spec=pltpu.PrefetchScalarGridSpec(
            num_scalar_prefetch=0,
            grid=(n_tiles,),
            in_specs=[
                pl.BlockSpec((rows, Cin), lambda i: (i, 0)),   # x row tile
                _const_spec((Cin, Cout), lambda i: (0, 0)),    # conv w (+BN scale)
                _const_spec((1, Cout), lambda i: (0, 0)),      # BN shift
                _const_spec((Bn, rows), lambda i: (0, 0)),     # pool matrix
                _const_spec((Cout, NCp), lambda i: (0, 0)),    # fc weight (*1/HW)
                _const_spec((1, NCp), lambda i: (0, 0)),       # fc bias
            ],
            out_specs=pl.BlockSpec((Bn, NCp), lambda i: (i, 0)),
        ),
        compiler_params=pltpu.CompilerParams(
            dimension_semantics=("parallel",),
            vmem_limit_bytes=vmem_limit),
        cost_estimate=pl.CostEstimate(flops=flops,
                                      transcendentals=transcendentals,
                                      bytes_accessed=bytes_accessed),
    )(x2, wc, shift, pool, wfc, bfc)

    return out[:N, :NC]


def reference_forward(x_nchw, conv_w, bn_gamma, bn_beta, bn_mean, bn_var,
                      bn_eps, fc_w, fc_b):
    N, Cin, H, W = x_nchw.shape
    Cout = conv_w.shape[0]
    # 1x1 conv (bias=False)
    x = jnp.transpose(x_nchw, (0, 2, 3, 1)).reshape(N, H * W, Cin)
    h = jnp.einsum("npc,oc->npo", x, conv_w.reshape(Cout, Cin))
    # BN (inference)
    h = (h - bn_mean) / jnp.sqrt(bn_var + bn_eps) * bn_gamma + bn_beta
    # swish
    h = h * jax.nn.sigmoid(h)
    # global average pool + fc
    pooled = jnp.mean(h, axis=1)                               # (N, Cout)
    return pooled @ fc_w.T + fc_b


if __name__ == "__main__":
    # Small, deterministic shapes consistent with the module:
    #   conv_head input channels = 3 * in_channels = 24
    #   out_channels (stand-in for round_filters(1280)) = 64
    #   num_classes = 10, image 8x8, batch 12 (exercises batch padding + a
    #   2-step grid so both v7x TensorCores get work).
    N, Cin, H, W = 12, 24, 8, 8
    Cout, NC = 64, 10
    bn_eps = 1e-3  # EfficientNet's batch_norm_epsilon

    key = jax.random.PRNGKey(0)
    k = jax.random.split(key, 8)
    x = jax.random.normal(k[0], (N, Cin, H, W), dtype=jnp.float32)
    conv_w = jax.random.normal(k[1], (Cout, Cin, 1, 1), jnp.float32) * 0.05
    bn_gamma = 1.0 + 0.1 * jax.random.normal(k[2], (Cout,), jnp.float32)
    bn_beta = 0.1 * jax.random.normal(k[3], (Cout,), jnp.float32)
    bn_mean = 0.1 * jax.random.normal(k[4], (Cout,), jnp.float32)
    bn_var = 1.0 + 0.1 * jax.random.uniform(k[5], (Cout,), jnp.float32)
    fc_w = jax.random.normal(k[6], (NC, Cout), jnp.float32) * 0.05
    fc_b = 0.1 * jax.random.normal(k[7], (NC,), jnp.float32)

    out = classifier_forward(x, conv_w, bn_gamma, bn_beta, bn_mean, bn_var,
                             bn_eps, fc_w, fc_b, batch_tile=8)
    out = jax.block_until_ready(out)

    ref = reference_forward(x, conv_w, bn_gamma, bn_beta, bn_mean, bn_var,
                            bn_eps, fc_w, fc_b)
    # bf16 matmul operands (f32 accumulate) -> loosen tolerance vs pure f32.
    np.testing.assert_allclose(np.asarray(out), np.asarray(ref),
                               rtol=2e-2, atol=2e-2)
    print("KERNEL_OK")
</pallas_src>

<mosaic_0001>
module attributes {stable_mosaic.version = 11 : i64} {
  func.func @classifier_kernel(%arg0: i32, %arg1: memref<512x24xbf16, #tpu.memory_space<vmem>>, %arg2: memref<24x64xbf16, #tpu.memory_space<vmem>>, %arg3: memref<1x64xf32, #tpu.memory_space<vmem>>, %arg4: memref<8x512xbf16, #tpu.memory_space<vmem>>, %arg5: memref<64x128xbf16, #tpu.memory_space<vmem>>, %arg6: memref<1x128xf32, #tpu.memory_space<vmem>>, %arg7: memref<8x128xf32, #tpu.memory_space<vmem>>) attributes {dimension_semantics = [#tpu.dimension_semantics<parallel>], iteration_bounds = array<i64: 2>, scalar_prefetch = 0 : i64, scratch_operands = 0 : i64, tpu.core_type = #tpu.core_type<tc>, window_params = [{transform_indices = @transform_0, window_bounds = array<i64: 512, 24>}, {pipeline_mode = #tpu.pipeline_mode<synchronous>, transform_indices = @transform_1, window_bounds = array<i64: 24, 64>}, {pipeline_mode = #tpu.pipeline_mode<synchronous>, transform_indices = @transform_2, window_bounds = array<i64: 1, 64>}, {pipeline_mode = #tpu.pipeline_mode<synchronous>, transform_indices = @transform_3, window_bounds = array<i64: 8, 512>}, {pipeline_mode = #tpu.pipeline_mode<synchronous>, transform_indices = @transform_4, window_bounds = array<i64: 64, 128>}, {pipeline_mode = #tpu.pipeline_mode<synchronous>, transform_indices = @transform_5, window_bounds = array<i64: 1, 128>}, {transform_indices = @transform_6, window_bounds = array<i64: 8, 128>}]} {
    %c0 = arith.constant 0 : index
    %c0_0 = arith.constant 0 : index
    %0 = vector.load %arg1[%c0, %c0_0] : memref<512x24xbf16, #tpu.memory_space<vmem>>, vector<512x24xbf16>
    %c0_1 = arith.constant 0 : index
    %c0_2 = arith.constant 0 : index
    %1 = vector.load %arg2[%c0_1, %c0_2] : memref<24x64xbf16, #tpu.memory_space<vmem>>, vector<24x64xbf16>
    %cst = arith.constant dense<0.000000e+00> : vector<512x64xf32>
    %2 = tpu.matmul %0, %1, %cst {dimension_numbers = #tpu.dot_dimension_numbers<[1], [0], [0], [1], [0, 0, 1, 1], [], []>} : vector<512x24xbf16>, vector<24x64xbf16>, vector<512x64xf32> -> vector<512x64xf32>
    %c0_3 = arith.constant 0 : index
    %c0_4 = arith.constant 0 : index
    %3 = vector.load %arg3[%c0_3, %c0_4] : memref<1x64xf32, #tpu.memory_space<vmem>>, vector<1x64xf32>
    %4 = vector.broadcast %3 : vector<1x64xf32> to vector<512x64xf32>
    %5 = arith.addf %2, %4 : vector<512x64xf32>
    %6 = arith.negf %5 : vector<512x64xf32>
    %7 = math.exp %6 : vector<512x64xf32>
    %cst_5 = arith.constant 1.000000e+00 : f32
    %8 = vector.broadcast %cst_5 : f32 to vector<512x64xf32>
    %9 = arith.addf %8, %7 : vector<512x64xf32>
    %10 = arith.divf %8, %9 : vector<512x64xf32>
    %11 = arith.mulf %5, %10 : vector<512x64xf32>
    %c0_6 = arith.constant 0 : index
    %c0_7 = arith.constant 0 : index
    %12 = vector.load %arg4[%c0_6, %c0_7] : memref<8x512xbf16, #tpu.memory_space<vmem>>, vector<8x512xbf16>
    %13 = arith.truncf %11 : vector<512x64xf32> to vector<512x64xbf16>
    %cst_8 = arith.constant dense<0.000000e+00> : vector<8x64xf32>
    %14 = tpu.matmul %12, %13, %cst_8 {dimension_numbers = #tpu.dot_dimension_numbers<[1], [0], [0], [1], [0, 0, 1, 1], [], []>} : vector<8x512xbf16>, vector<512x64xbf16>, vector<8x64xf32> -> vector<8x64xf32>
    %15 = arith.truncf %14 : vector<8x64xf32> to vector<8x64xbf16>
    %c0_9 = arith.constant 0 : index
    %c0_10 = arith.constant 0 : index
    %16 = vector.load %arg5[%c0_9, %c0_10] : memref<64x128xbf16, #tpu.memory_space<vmem>>, vector<64x128xbf16>
    %cst_11 = arith.constant dense<0.000000e+00> : vector<8x128xf32>
    %17 = tpu.matmul %15, %16, %cst_11 {dimension_numbers = #tpu.dot_dimension_numbers<[1], [0], [0], [1], [0, 0, 1, 1], [], []>} : vector<8x64xbf16>, vector<64x128xbf16>, vector<8x128xf32> -> vector<8x128xf32>
    %c0_12 = arith.constant 0 : index
    %c0_13 = arith.constant 0 : index
    %18 = vector.load %arg6[%c0_12, %c0_13] : memref<1x128xf32, #tpu.memory_space<vmem>>, vector<1x128xf32>
    %19 = vector.broadcast %18 : vector<1x128xf32> to vector<8x128xf32>
    %20 = arith.addf %17, %19 : vector<8x128xf32>
    %c0_14 = arith.constant 0 : index
    %c0_15 = arith.constant 0 : index
    %21 = vector.load %arg7[%c0_14, %c0_15] : memref<8x128xf32, #tpu.memory_space<vmem>>, vector<8x128xf32>
    tpu.vector_store %arg7[%c0_14, %c0_15], %20 {strides = array<i32>} : memref<8x128xf32, #tpu.memory_space<vmem>>, vector<8x128xf32>,
    return
  }
  func.func @transform_0(%arg0: i32) -> (i32, i32) {
    %c0_i32 = arith.constant 0 : i32
    %c0_i32_0 = arith.constant 0 : i32
    return %arg0, %c0_i32 : i32, i32
  }
  func.func @transform_1(%arg0: i32) -> (i32, i32) {
    %c0_i32 = arith.constant 0 : i32
    %c0_i32_0 = arith.constant 0 : i32
    %c0_i32_1 = arith.constant 0 : i32
    return %c0_i32, %c0_i32_0 : i32, i32
  }
  func.func @transform_2(%arg0: i32) -> (i32, i32) {
    %c0_i32 = arith.constant 0 : i32
    %c0_i32_0 = arith.constant 0 : i32
    %c0_i32_1 = arith.constant 0 : i32
    return %c0_i32, %c0_i32_0 : i32, i32
  }
  func.func @transform_3(%arg0: i32) -> (i32, i32) {
    %c0_i32 = arith.constant 0 : i32
    %c0_i32_0 = arith.constant 0 : i32
    %c0_i32_1 = arith.constant 0 : i32
    return %c0_i32, %c0_i32_0 : i32, i32
  }
  func.func @transform_4(%arg0: i32) -> (i32, i32) {
    %c0_i32 = arith.constant 0 : i32
    %c0_i32_0 = arith.constant 0 : i32
    %c0_i32_1 = arith.constant 0 : i32
    return %c0_i32, %c0_i32_0 : i32, i32
  }
  func.func @transform_5(%arg0: i32) -> (i32, i32) {
    %c0_i32 = arith.constant 0 : i32
    %c0_i32_0 = arith.constant 0 : i32
    %c0_i32_1 = arith.constant 0 : i32
    return %c0_i32, %c0_i32_0 : i32, i32
  }
  func.func @transform_6(%arg0: i32) -> (i32, i32) {
    %c0_i32 = arith.constant 0 : i32
    %c0_i32_0 = arith.constant 0 : i32
    return %arg0, %c0_i32 : i32, i32
  }
}

</mosaic_0001>

<bundles_post_ra>
// kernel: tpu_custom_call.1
= control target key start
LH: loop header
LB: loop body
LE: loop exit
PB: predicated region body
PF: predicated region fallthrough
CT: control target
= control target key end

     0   :  { %11 = vsyncpa [#allocation3], 0  ;;  %s5540_s0 = inlined_call_operand.vmem [shape: bf16[1024,24], index: 0, kind: input, shape index: {}]   ;;  %s5541_s1 = inlined_call_operand.vmem [shape: bf16[24,64], index: 1, kind: input, shape index: {}]   ;;  %s5542_s2 = inlined_call_operand.vmem [shape: f32[1,64], index: 2, kind: input, shape index: {}]   ;;  %s5543_s3 = inlined_call_operand.vmem [shape: bf16[8,512], index: 3, kind: input, shape index: {}]   ;;  %s5544_s4 = inlined_call_operand.vmem [shape: bf16[64,128], index: 4, kind: input, shape index: {}]   ;;  %s5545_s5 = inlined_call_operand.vmem [shape: f32[1,128], index: 5, kind: input, shape index: {}]   ;;  %s5546_s6 = inlined_call_operand.hbm [shape: f32[16,128], index: 6, kind: output, shape index: {}]  }
   0x1   :  { %13 = vsyncpa [#allocation3 + $0x1], 0  ;;  %s2970_s21 = smov 0   ;;  %s2972_s22 = smov 0  }
   0x2   :  { %s2974_s23 = smov 0   ;;  %s2976_s24 = smov 0  }
   0x3 LB: > { %s2991_s25 = sadd.s32 4294967295, %s2933_s24   ;;  %s2273_s26 = sadd.s32 4294967294, %s2933_s24   ;;  %s2933_s24 = sphi %s2976_s24, %s5903_s24   ;;  %s2929_s23 = sphi %s2974_s23, %s5902_s23   ;;  %s2925_s22 = sphi %s2972_s22, %s5901_s22   ;;  %s2921_s21 = sphi %s2970_s21, %s5900_s21  }
   0x4   : > { %s2995_s27 = sadd.s32 1, %s2933_s24   ;;  %s157_s28 = sadd.s32 1, %s2929_s23 }
   0x5   : > { %s154_s29 = ssub.s32 %s2933_s24, %s2995_s27  ;;  %p167_p0 = scmp.ne.s32.totalorder %s2929_s23, %s2925_s22 }
   0x6   : > { %p155_p1 = scmp.eq.s32.totalorder %s154_s29, 0  ;;  %p168_p2 = scmp.eq.s32.totalorder %s2991_s25, 1 }
   0x7   : > { %p173_p3 = scmp.ne.s32.totalorder %s2925_s22, %s2921_s21  ;;  %p174_p4 = scmp.eq.s32.totalorder %s2273_s26, 1 }
   0x8   : > { %s3006_s30 = scalar_select %p155_p1, %s2929_s23, %s157_s28  }
   0x9   : > { %p3008_p5 = por %p168_p2, %p167_p0  ;;  %p3012_p6 = por %p174_p4, %p173_p3 }
   0xa   : > { %p2276_p7 = scmp.ge.s32.totalorder %s2933_s24, 1  ;;  %p216_p8 = scmp.lt.s32.totalorder %s2933_s24, 3 }
   0xc   : > { %p217_p9 = pnand %p2276_p7, %p216_p8 }
   0xe   : > { %220 = sbr.rel (%p217_p9) target bundleno = 755 (0x2f3), region = 44 }
  0x13   : > { %v319_v0 = vld [vmem:[%s5541_s1 + $0x8] sm:$0xf]  ;;  %s2278_s11 = sshll.u32 %s2991_s25, 6  ;;  %vm590_vm0 = vcmask 1043456   ;;  %v2561_v4 = vld [vmem:[%s5541_s1] sm:$0xff]  ;;  %vm493_vm1 = vcmask 195584  }
  0x14   : > { %v489_v1 = vunpack.c.l.b16 %v319_v0  ;;  %p247_p10 = scmp.lt.s32.totalorder %s2278_s11, 127  ;;  %v3093_v35 = vld [vmem:[%s5542_s2] ss:$0 sm:$0xff]  ;;  %s243_s26 = sand.u32 1, %s2925_s22  }
  0x15   : > { %s2526_s28 = sshll.u32 %s2991_s25, 3  ;;  %s2277_s29 = sshll.u32 %s243_s26, 3 }
  0x16   : > { %v491_v2 = vpack.c.b16 %v489_v1, %v489_v1  ;;  %s5905_s11 = smov (!%p247_p10, %s2278_s11), 127  ;;  %s245_s14 = scalar_lea.vmem [#allocation2], %s2277_s29 }
  0x17   : > { %s2279_s12 = sshll.u32 %s5905_s11, 2  ;;  %s2209_s11 = scalar_lea.hbm %s5546_s6, %s2526_s28 }
  0x18   : > { %v592_v3 = vsel %vm590_vm0, %v491_v2, 0  ;;  %s3028_s17 = scalar_lea.vmem %s5540_s0, %s2279_s12  ;;  %s2211_s15 = sshll.u32 %s245_s14, 4  ;;  %s2212_s15 = int_to_ptr.vmem [resolvable:$true] %s2211_s15 }
  0x19   : > { %600 = vmatpush.bf16.msra.mxu0 %v592_v3  ;;  %2566 = vmatpush.bf16.msra.mxu1 %v592_v3  ;;  %v2529_v5 = vld [vmem:[%s3028_s17] sm:$0xff]  ;;  %v2540_v6 = vld [vmem:[%s3028_s17 + $0x58] sm:$0xff]  ;;  %v2530_v9 = vld [vmem:[%s3028_s17 + $0x8] sm:$0xff]  ;;  %s2213_s16 = sshll.u32 %s2209_s11, 4  ;;  %s2891_s28 = scalar_lea.hbm %s5546_s6, 16  ;;  %s2214_s16 = int_to_ptr.hbm [resolvable:$true] %s2213_s16 }
  0x1a   : > { %2567 = vmatpush.bf16.msra.mxu2 %v592_v3  ;;  %2568 = vmatpush.bf16.msra.mxu3 %v592_v3  ;;  %v2544_v7 = vld [vmem:[%s3028_s17 + $0x78] sm:$0xff]  ;;  %v2541_v10 = vld [vmem:[%s3028_s17 + $0x60] sm:$0xff]  ;;  %v2531_v13 = vld [vmem:[%s3028_s17 + $0x10] sm:$0xff]  ;;  %s2885_s25 = sshra.s32 %s2214_s16, 4  ;;  %s2886_s25 = int_to_ptr.hbm [resolvable:$true] %s2885_s25 }
  0x1b   : > { %v2552_v8 = vld [vmem:[%s3028_s17 + $0xb8] sm:$0xff]  ;;  %v2545_v11 = vld [vmem:[%s3028_s17 + $0x80] sm:$0xff]  ;;  %v2542_v14 = vld [vmem:[%s3028_s17 + $0x68] sm:$0xff]  ;;  %s2887_s18 = scalar_lea.hbm %s2886_s25, 8  ;;  %p2892_p0 = scmp.lt.s32.totalorder %s2886_s25, %s5546_s6 }
  0x1c   : > { %v2553_v12 = vld [vmem:[%s3028_s17 + $0xc0] sm:$0xff]  ;;  %v2546_v15 = vld [vmem:[%s3028_s17 + $0x88] sm:$0xff]  ;;  %v2532_v17 = vld [vmem:[%s3028_s17 + $0x18] sm:$0xff]  ;;  %p2888_p11 = scmp.ne.s32.totalorder %s2886_s25, %s2887_s18  ;;  %p2893_p1 = scmp.lt.s32.totalorder %s2891_s28, %s2887_s18 }
  0x1d   : > { %601 = vmatpush.bf16.msra.mxu0 %v2561_v4  ;;  %2569 = vmatpush.bf16.msra.mxu1 %v2561_v4  ;;  %v2554_v16 = vld [vmem:[%s3028_s17 + $0xc8] sm:$0xff]  ;;  %v2543_v18 = vld [vmem:[%s3028_s17 + $0x70] sm:$0xff]  ;;  %v2533_v21 = vld [vmem:[%s3028_s17 + $0x20] sm:$0xff] }
  0x1e   : > { %2570 = vmatpush.bf16.msra.mxu2 %v2561_v4  ;;  %2571 = vmatpush.bf16.msra.mxu3 %v2561_v4  ;;  %v2547_v19 = vld [vmem:[%s3028_s17 + $0x90] sm:$0xff]  ;;  %v2548_v22 = vld [vmem:[%s3028_s17 + $0x98] sm:$0xff]  ;;  %v2534_v24 = vld [vmem:[%s3028_s17 + $0x28] sm:$0xff]  ;;  %p2889_p12 = pnand %p2888_p11, %p3008_p5  ;;  %p2894_p2 = por %p2893_p1, %p2892_p0 }
  0x1f   : > { %v2555_v20 = vld [vmem:[%s3028_s17 + $0xd0] sm:$0xff]  ;;  %v2556_v23 = vld [vmem:[%s3028_s17 + $0xd8] sm:$0xff]  ;;  %v2549_v25 = vld [vmem:[%s3028_s17 + $0xa0] sm:$0xff] }
  0x20   : > { %2412 = vmatmul.msk.bf16.vlgmr.msra.gmra.mxu0 %vm493_vm1, %v2529_v5  ;;  %2423 = vmatmul.msk.bf16.vlgmr.msra.gmra.mxu1 %vm493_vm1, %v2540_v6  ;;  %v2557_v26 = vld [vmem:[%s3028_s17 + $0xe0] sm:$0xff]  ;;  %v2535_v27 = vld [vmem:[%s3028_s17 + $0x30] sm:$0xff]  ;;  %v2550_v28 = vld [vmem:[%s3028_s17 + $0xa8] sm:$0xff]  ;;  %p2890_p13 = pneg %p2889_p12 }
  0x21   : > { %2427 = vmatmul.msk.bf16.vlgmr.msra.gmra.mxu2 %vm493_vm1, %v2544_v7  ;;  %2435 = vmatmul.msk.bf16.vlgmr.msra.gmra.mxu3 %vm493_vm1, %v2552_v8  ;;  %v2558_v29 = vld [vmem:[%s3028_s17 + $0xe8] sm:$0xff]  ;;  %v2536_v30 = vld [vmem:[%s3028_s17 + $0x38] sm:$0xff]  ;;  %v2551_v31 = vld [vmem:[%s3028_s17 + $0xb0] sm:$0xff] }
  0x22   : > { %v2559_v32 = vld [vmem:[%s3028_s17 + $0xf0] sm:$0xff]  ;;  %v2537_v33 = vld [vmem:[%s3028_s17 + $0x40] sm:$0xff]  ;;  %v2560_v34 = vld [vmem:[%s3028_s17 + $0xf8] sm:$0xff]  ;;  %p2895_p3 = pnand %p2894_p2, %p2890_p13 }
  0x23   : > { %v2538_v37 = vld [vmem:[%s3028_s17 + $0x48] sm:$0xff]  ;;  %v2539_v52 = vld [vmem:[%s3028_s17 + $0x50] sm:$0xff]  ;;  %s2199_s17 = scalar_lea.sflag [#allocation3], %s243_s26 }
  0x30   : > { %2413 = vmatmul.msk.bf16.gmra.mxu0 %vm493_vm1, %v2530_v9  ;;  %2424 = vmatmul.msk.bf16.gmra.mxu1 %vm493_vm1, %v2541_v10 }
  0x31   : > { %2428 = vmatmul.msk.bf16.gmra.mxu2 %vm493_vm1, %v2545_v11  ;;  %2436 = vmatmul.msk.bf16.gmra.mxu3 %vm493_vm1, %v2553_v12 }
  0x40   : > { %2414 = vmatmul.msk.bf16.gmra.mxu0 %vm493_vm1, %v2531_v13  ;;  %2425 = vmatmul.msk.bf16.gmra.mxu1 %vm493_vm1, %v2542_v14 }
  0x41   : > { %2429 = vmatmul.msk.bf16.gmra.mxu2 %vm493_vm1, %v2546_v15  ;;  %2437 = vmatmul.msk.bf16.gmra.mxu3 %vm493_vm1, %v2554_v16 }
  0x50   : > { %2415 = vmatmul.msk.bf16.gmra.mxu0 %vm493_vm1, %v2532_v17  ;;  %2426 = vmatmul.msk.bf16.gmra.mxu1 %vm493_vm1, %v2543_v18 }
  0x51   : > { %2430 = vmatmul.msk.bf16.gmra.mxu2 %vm493_vm1, %v2547_v19  ;;  %2438 = vmatmul.msk.bf16.gmra.mxu3 %vm493_vm1, %v2555_v20 }
  0x60   : > { %2416 = vmatmul.msk.bf16.gmra.mxu0 %vm493_vm1, %v2533_v21 }
  0x61   : > { %2431 = vmatmul.msk.bf16.gmra.mxu2 %vm493_vm1, %v2548_v22  ;;  %2439 = vmatmul.msk.bf16.gmra.mxu3 %vm493_vm1, %v2556_v23 }
  0x70   : > { %2417 = vmatmul.msk.bf16.gmra.mxu0 %vm493_vm1, %v2534_v24 }
  0x71   : > { %2432 = vmatmul.msk.bf16.gmra.mxu2 %vm493_vm1, %v2549_v25  ;;  %2440 = vmatmul.msk.bf16.gmra.mxu3 %vm493_vm1, %v2557_v26 }
  0x80   : > { %2418 = vmatmul.msk.bf16.gmra.mxu0 %vm493_vm1, %v2535_v27 }
  0x81   : > { %2433 = vmatmul.msk.bf16.gmra.mxu2 %vm493_vm1, %v2550_v28  ;;  %2441 = vmatmul.msk.bf16.gmra.mxu3 %vm493_vm1, %v2558_v29 }
  0x90   : > { %2419 = vmatmul.msk.bf16.gmra.mxu0 %vm493_vm1, %v2536_v30 }
  0x91   : > { %2434 = vmatmul.msk.bf16.gmra.mxu2 %vm493_vm1, %v2551_v31  ;;  %2442 = vmatmul.msk.bf16.gmra.mxu3 %vm493_vm1, %v2559_v32 }
  0x9d   : > { %v603_v36 = vpop.f32.mrf.mxu0  ;;  %v658_v39 = vpop.f32.mrf.mxu1 }
  0x9e   : > { %v3097_v38 = vadd.f32 %v3093_v35, %v603_v36  ;;  %v3100_v40 = vadd.f32 %v3093_v35, %v658_v39 }
  0xa0   : > { %2420 = vmatmul.msk.bf16.gmra.mxu0 %vm493_vm1, %v2537_v33  ;;  %v2444_v41 = vmul.f32 -1.442695, %v3097_v38  ;;  %v2466_v42 = vmul.f32 -1.442695, %v3100_v40 }
  0xa1   : > { %2443 = vmatmul.msk.bf16.gmra.mxu3 %vm493_vm1, %v2560_v34 }
  0xa2   : > { %2613 = vpow2.f32 %v2444_v41 }
  0xa3   : > { %2615 = vpow2.f32 %v2466_v42 }
  0xa4   : > { %v678_v43 = vpop.f32.mrf.mxu2  ;;  %v718_v50 = vpop.f32.mrf.mxu3 }
  0xa5   : > { %v3106_v44 = vadd.f32 %v3093_v35, %v678_v43  ;;  %v605_v45 = vpop.f32.mrf.mxu0  ;;  %v660_v51 = vpop.f32.mrf.mxu1  ;;  %v3121_v56 = vadd.f32 %v3093_v35, %v718_v50 }
  0xa6   : > { %v3110_v49 = vadd.f32 %v3093_v35, %v605_v45  ;;  %v3116_v54 = vadd.f32 %v3093_v35, %v660_v51 }
  0xa7   : > { %v2474_v48 = vmul.f32 -1.442695, %v3106_v44  ;;  %v2490_v61 = vmul.f32 -1.442695, %v3121_v56 }
  0xa8   : > { %v2614_v46 = vpop.eup %2613  ;;  %v2445_v58 = vmul.f32 -1.442695, %v3110_v49  ;;  %v2467_v59 = vmul.f32 -1.442695, %v3116_v54 }
  0xa9   : > { %v2616_v47 = vpop.eup %2615  ;;  %v3113_v53 = vadd.f32 1.0, %v2614_v46  ;;  %2617 = vpow2.f32 %v2474_v48 }
  0xaa   : > { %v3118_v55 = vadd.f32 1.0, %v2616_v47 }
  0xab   : > { %2619 = vrcp.f32 %v3113_v53  ;;  %vm1024_vm2 = vweird.f32 %v3113_v53  ;;  %v1028_v25 = vand.u32 2147483647, %v3113_v53  ;;  %v1030_v28 = vand.u32 2147483648, %v3113_v53 }
  0xac   : > { %v680_v57 = vpop.f32.mrf.mxu2  ;;  %2621 = vrcp.f32 %v3118_v55  ;;  %v720_v20 = vpop.f32.mrf.mxu3  ;;  %v1358_v29 = vand.u32 2147483647, %v3118_v55  ;;  %v1360_v30 = vand.u32 2147483648, %v3118_v55  ;;  %vm1354_vm4 = vweird.f32 %v3118_v55 }
  0xad   : > { %v3128_v60 = vadd.f32 %v3093_v35, %v680_v57  ;;  %v608_v62 = vpop.f32.mrf.mxu0  ;;  %2623 = vpow2.f32 %v2445_v58  ;;  %v663_v10 = vpop.f32.mrf.mxu1  ;;  %v3170_v27 = vadd.f32 %v3093_v35, %v720_v20  ;;  %vm3187_vm6 = vcmp.eq.f32.partialorder %v1028_v25, 8.507059e+37 }
  0xae   : > { %2625 = vpow2.f32 %v2467_v59  ;;  %v3134_v1 = vadd.f32 %v3093_v35, %v608_v62  ;;  %v3151_v13 = vadd.f32 %v3093_v35, %v663_v10  ;;  %v1031_v46 = vor.u32 1.1754944e-38, %v1030_v28 }
  0xaf   : > { %v2618_v63 = vpop.eup %2617  ;;  %v2475_v0 = vmul.f32 -1.442695, %v3128_v60  ;;  %2627 = vpow2.f32 %v2490_v61  ;;  %v2491_v42 = vmul.f32 -1.442695, %v3170_v27  ;;  %vm3202_vm8 = vcmp.eq.f32.partialorder %v1358_v29, 8.507059e+37 }
  0xb0   : > { %2421 = vmatmul.msk.bf16.gmra.mxu0 %vm493_vm1, %v2538_v37  ;;  %v3140_v4 = vadd.f32 1.0, %v2618_v63  ;;  %v2446_v6 = vmul.f32 -1.442695, %v3134_v1  ;;  %v2468_v19 = vmul.f32 -1.442695, %v3151_v13  ;;  %v1361_v50 = vor.u32 1.1754944e-38, %v1360_v30 }
  0xb1   : > { %v3136_v2 = vpop.eup %2619  ;;  %2629 = vpow2.f32 %v2475_v0 }
  0xb2   : > { %v3138_v3 = vpop.eup %2621  ;;  %v1020_v7 = vmul.f32 %v3136_v2, %v3113_v53  ;;  %2631 = vrcp.f32 %v3140_v4  ;;  %vm1025_vm3 = vweird.f32 %v3136_v2  ;;  %v1480_v36 = vand.u32 2147483648, %v3140_v4 }
  0xb3   : > { %v2624_v5 = vpop.eup %2623  ;;  %v1350_v9 = vmul.f32 %v3138_v3, %v3118_v55  ;;  %2633 = vpow2.f32 %v2446_v6  ;;  %vm1355_vm5 = vweird.f32 %v3138_v3  ;;  %vm3213_vm9 = vmor %vm1024_vm2, %vm1025_vm3  ;;  %vm1474_vm10 = vweird.f32 %v3140_v4 }
  0xb4   : > { %v2626_v8 = vpop.eup %2625  ;;  %v3148_v12 = vadd.f32 1.0, %v2624_v5  ;;  %v1021_v14 = vsub.f32 1.0, %v1020_v7  ;;  %v683_v31 = vpop.f32.mrf.mxu2  ;;  %vm3198_vm7 = vmor %vm1354_vm4, %vm1355_vm5  ;;  %v1478_v58 = vand.u32 2147483647, %v3140_v4  ;;  %v3224_v0 = vor.u32 1.1754944e-38, %v1480_v36 }
  0xb5   : > { %v2628_v11 = vpop.eup %2627  ;;  %v3153_v15 = vadd.f32 1.0, %v2626_v8  ;;  %v1351_v17 = vsub.f32 1.0, %v1350_v9  ;;  %v3194_v43 = vadd.f32 %v3093_v35, %v683_v31  ;;  %v610_v61 = vpop.f32.mrf.mxu0 }
  0xb6   : > { %v3155_v18 = vadd.f32 1.0, %v2628_v11  ;;  %2635 = vrcp.f32 %v3148_v12  ;;  %v1022_v22 = vmul.f32 %v3136_v2, %v1021_v14  ;;  %v1045_v51 = vand.u32 2147483648, %v3148_v12  ;;  %v723_v25 = vpop.f32.mrf.mxu3 }
  0xb7   : > { %v2630_v16 = vpop.eup %2629  ;;  %2637 = vrcp.f32 %v3153_v15  ;;  %v1352_v26 = vmul.f32 %v3138_v3, %v1351_v17  ;;  %v1043_v53 = vand.u32 2147483647, %v3148_v12  ;;  %v2476_v7 = vmul.f32 -1.442695, %v3194_v43 }
  0xb8   : > { %v3159_v21 = vpop.eup %2631  ;;  %v3164_v23 = vadd.f32 1.0, %v2630_v16  ;;  %2639 = vrcp.f32 %v3155_v18  ;;  %v1023_v34 = vadd.f32 %v3136_v2, %v1022_v22  ;;  %v3236_v9 = vor.u32 1.1754944e-38, %v1045_v51 }
  0xb9   : > { %v2634_v24 = vpop.eup %2633  ;;  %2641 = vpow2.f32 %v2468_v19  ;;  %v1470_v32 = vmul.f32 %v3159_v21, %v3140_v4  ;;  %v1353_v41 = vadd.f32 %v3138_v3, %v1352_v26  ;;  %v1375_v10 = vand.u32 2147483648, %v3153_v15 }
  0xba   : > { %2643 = vrcp.f32 %v3164_v23  ;;  %v3185_v37 = vadd.f32 1.0, %v2634_v24  ;;  %v1027_v63 = vsel %vm3213_vm9, %v3136_v2, %v1023_v34  ;;  %v1373_v2 = vand.u32 2147483647, %v3153_v15  ;;  %v665_v24 = vpop.f32.mrf.mxu1 }
  0xbb   : > { %v1471_v57 = vsub.f32 1.0, %v1470_v32  ;;  %v1357_v5 = vsel %vm3198_vm7, %v3138_v3, %v1353_v41  ;;  %v1032_v3 = vsel %vm3187_vm6, %v1031_v46, %v1027_v63  ;;  %vm3245_vm11 = vcmp.eq.f32.partialorder %v1478_v58, 8.507059e+37 }
  0xbc   : > { %v3180_v33 = vpop.eup %2635  ;;  %2645 = vrcp.f32 %v3185_v37  ;;  %vm1369_vm12 = vweird.f32 %v3153_v15  ;;  %v1362_v20 = vsel %vm3202_vm8, %v1361_v50, %v1357_v5  ;;  %vm1475_vm13 = vweird.f32 %v3159_v21  ;;  %v685_v30 = vpop.f32.mrf.mxu2 }
  0xbd   : > { %v3196_v45 = vpop.eup %2637  ;;  %v1035_v59 = vmul.f32 %v3180_v33, %v3148_v12  ;;  %2647 = vpow2.f32 %v2491_v42  ;;  %v1472_v14 = vmul.f32 %v3159_v21, %v1471_v57  ;;  %vm1039_vm14 = vweird.f32 %v3148_v12 }
  0xbe   : > { %v1365_v6 = vmul.f32 %v3196_v45, %v3153_v15  ;;  %vm1714_vm15 = vweird.f32 %v3155_v18  ;;  %v3258_v22 = vadd.f32 %v3093_v35, %v610_v61  ;;  %2649 = vpow2.f32 %v2476_v7 }
  0xbf   : > { %v1036_v17 = vsub.f32 1.0, %v1035_v59  ;;  %v3263_v29 = vadd.f32 %v3093_v35, %v665_v24  ;;  %v3268_v32 = vmul.f32 %v1032_v3, %v3097_v38  ;;  %vm1040_vm0 = vweird.f32 %v3180_v33  ;;  %v613_v59 = vpop.f32.mrf.mxu0 }
  0xc0   : > { %2422 = vmatmul.msk.bf16.gmra.mxu0 %vm493_vm1, %v2539_v52  ;;  %v3207_v52 = vpop.eup %2639  ;;  %v1366_v26 = vsub.f32 1.0, %v1365_v6  ;;  %v3271_v34 = vor.u32 1.1754944e-38, %v1375_v10  ;;  %v1473_v41 = vadd.f32 %v3159_v21, %v1472_v14  ;;  %v3277_v46 = vadd.f32 %v3093_v35, %v723_v25  ;;  %vm3286_vm1 = vmor %vm1474_vm10, %vm1475_vm13 }
  0xc1   : > { %v2642_v62 = vpop.eup %2641  ;;  %v1710_v11 = vmul.f32 %v3207_v52, %v3155_v18  ;;  %5592 = vst [vmem:[#allocation5_spill] sm:$0xff] %v3268_v32  ;;  %v1037_v42 = vmul.f32 %v3180_v33, %v1036_v17  ;;  %v3280_v47 = vmul.f32 %v1362_v20, %v3100_v40  ;;  %v1718_v48 = vand.u32 2147483647, %v3155_v18  ;;  %vm3329_vm7 = vmor %vm1039_vm14, %vm1040_vm0 }
  0xc2   : > { %v3234_v8 = vpop.eup %2643  ;;  %v3250_v19 = vadd.f32 1.0, %v2642_v62  ;;  %v2447_v50 = vmul.f32 -1.442695, %v3258_v22  ;;  %v3293_v51 = vadd.f32 %v3093_v35, %v685_v30  ;;  %v1367_v55 = vmul.f32 %v3196_v45, %v1366_v26 }
  0xc3   : > { %v1485_v28 = vmul.f32 %v3234_v8, %v3164_v23  ;;  %v3265_v31 = vpop.eup %2645  ;;  %v1711_v36 = vsub.f32 1.0, %v1710_v11  ;;  %5593 = vst [vmem:[#allocation6_spill] sm:$0xff] %v3280_v47  ;;  %vm3296_vm2 = vcmp.eq.f32.partialorder %v1373_v2, 8.507059e+37  ;;  %v2469_v58 = vmul.f32 -1.442695, %v3263_v29 }
  0xc4   : > { %v2648_v39 = vpop.eup %2647  ;;  %2651 = vrcp.f32 %v3250_v19  ;;  %v1050_v4 = vmul.f32 %v3265_v31, %v3185_v37  ;;  %vm3303_vm3 = vcmp.eq.f32.partialorder %v1043_v53, 8.507059e+37  ;;  %vm1370_vm4 = vweird.f32 %v3196_v45 }
  0xc5   : > { %v1486_v57 = vsub.f32 1.0, %v1485_v28  ;;  %v1712_v62 = vmul.f32 %v3207_v52, %v1711_v36  ;;  %v1720_v63 = vand.u32 2147483648, %v3155_v18  ;;  %v3310_v5 = vadd.f32 1.0, %v2648_v39  ;;  %v2650_v6 = vpop.eup %2649  ;;  %vm3342_vm8 = vmor %vm1369_vm12, %vm1370_vm4 }
  0xc6   : > { %v1477_v7 = vsel %vm3286_vm1, %v3159_v21, %v1473_v41  ;;  %v1038_v2 = vadd.f32 %v3180_v33, %v1037_v42  ;;  %vm1489_vm5 = vweird.f32 %v3164_v23  ;;  %v2492_v53 = vmul.f32 -1.442695, %v3277_v46 }
  0xc7   : > { %vm1715_vm6 = vweird.f32 %v3207_v52  ;;  %2653 = vpow2.f32 %v2447_v50  ;;  %v2477_v10 = vmul.f32 -1.442695, %v3293_v51  ;;  %v3321_v11 = vadd.f32 %v3093_v35, %v613_v59 }
  0xc8   : > { %v1368_v14 = vadd.f32 %v3196_v45, %v1367_v55  ;;  %v1487_v17 = vmul.f32 %v3234_v8, %v1486_v57  ;;  %v1051_v20 = vsub.f32 1.0, %v1050_v4  ;;  %2655 = vpow2.f32 %v2469_v58  ;;  %vm3354_vm9 = vmor %vm1714_vm15, %vm1715_vm6 }
  0xc9   : > { %v1482_v24 = vsel %vm3245_vm11, %v3224_v0, %v1477_v7  ;;  %v1713_v25 = vadd.f32 %v3207_v52, %v1712_v62  ;;  %2657 = vrcp.f32 %v3310_v5  ;;  %v3348_v26 = vadd.f32 1.0, %v2650_v6 }
  0xca   : > { %v3323_v3 = vpop.eup %2651  ;;  %vm1490_vm10 = vweird.f32 %v3234_v8  ;;  %v1493_v15 = vand.u32 2147483647, %v3164_v23  ;;  %v1495_v16 = vand.u32 2147483648, %v3164_v23  ;;  %2659 = vpow2.f32 %v2492_v53 }
  0xcb   : > { %v1042_v28 = vsel %vm3329_vm7, %v3180_v33, %v1038_v2  ;;  %v1380_v30 = vmul.f32 %v3323_v3, %v3250_v19  ;;  %2661 = vpow2.f32 %v2477_v10  ;;  %v2448_v18 = vmul.f32 -1.442695, %v3321_v11  ;;  %vm3379_vm12 = vmor %vm1489_vm5, %vm1490_vm10  ;;  %v725_v2 = vpop.f32.mrf.mxu3 }
  0xcc   : > { %v1372_v36 = vsel %vm3342_vm8, %v3196_v45, %v1368_v14  ;;  %v1721_v39 = vor.u32 1.1754944e-38, %v1720_v63  ;;  %v1488_v41 = vadd.f32 %v3234_v8, %v1487_v17  ;;  %v1052_v42 = vmul.f32 %v3265_v31, %v1051_v20 }
  0xcd   : > { %v2654_v38 = vpop.eup %2653  ;;  %v1717_v33 = vsel %vm3354_vm9, %v3207_v52, %v1713_v25  ;;  %vm1719_vm11 = vcmp.eq.f32.partialorder %v1718_v48, 8.507059e+37  ;;  %v1058_v45 = vand.u32 2147483647, %v3185_v37  ;;  %2663 = vrcp.f32 %v3348_v26 }
  0xce   : > { %v2656_v55 = vpop.eup %2655  ;;  %v3386_v57 = vmul.f32 %v1482_v24, %v3106_v44  ;;  %v1047_v52 = vsel %vm3303_vm3, %v3236_v9, %v1042_v28  ;;  %vm3391_vm13 = vcmp.eq.f32.partialorder %v1493_v15, 8.507059e+37  ;;  %v1060_v23 = vand.u32 2147483648, %v3185_v37 }
  0xcf   : > { %v3396_v4 = vpop.eup %2657  ;;  %v1377_v58 = vsel %vm3296_vm2, %v3271_v34, %v1372_v36  ;;  %v1496_v59 = vor.u32 1.1754944e-38, %v1495_v16  ;;  %v1381_v62 = vsub.f32 1.0, %v1380_v30  ;;  %2665 = vpow2.f32 %v2448_v18 }
  0xd0   : > { %v2660_v44 = vpop.eup %2659  ;;  %v1722_v63 = vsel %vm1719_vm11, %v1721_v39, %v1717_v33  ;;  %v1492_v9 = vsel %vm3379_vm12, %v3234_v8, %v1488_v41  ;;  %v1053_v61 = vadd.f32 %v3265_v31, %v1052_v42  ;;  %vm1055_vm14 = vweird.f32 %v3265_v31 }
  0xd1   : > { %v2662_v6 = vpop.eup %2661  ;;  %v3407_v7 = vmul.f32 %v1047_v52, %v3110_v49  ;;  %vm1054_vm15 = vweird.f32 %v3185_v37  ;;  %vm3410_vm0 = vcmp.eq.f32.partialorder %v1058_v45, 8.507059e+37  ;;  %v3414_v40 = vadd.f32 1.0, %v2654_v38  ;;  %v688_v38 = vpop.f32.mrf.mxu2 }
  0xd2   : > { %v3417_v53 = vmul.f32 %v1377_v58, %v3116_v54  ;;  %v1061_v8 = vor.u32 1.1754944e-38, %v1060_v23  ;;  %v1725_v10 = vmul.f32 %v3396_v4, %v3310_v5  ;;  %v3421_v21 = vadd.f32 1.0, %v2656_v55  ;;  %vm3430_vm1 = vmor %vm1054_vm15, %vm1055_vm14 }
  0xd3   : > { %5610 = vst [vmem:[#allocation7_spill] sm:$0xff] %v3407_v7  ;;  %v3423_v49 = vpop.eup %2663  ;;  %v3426_v37 = vmul.f32 %v1722_v63, %v3121_v56  ;;  %v1497_v14 = vsel %vm3391_vm13, %v1496_v59, %v1492_v9  ;;  %v1382_v54 = vmul.f32 %v3323_v3, %v1381_v62  ;;  %v3435_v20 = vadd.f32 1.0, %v2660_v44  ;;  %v668_v56 = vpop.f32.mrf.mxu1 }
  0xd4   : > { %5613 = vst [vmem:[#allocation8_spill] sm:$0xff] %v3417_v53  ;;  %v1057_v24 = vsel %vm3430_vm1, %v3265_v31, %v1053_v61  ;;  %v1388_v12 = vand.u32 2147483647, %v3250_v19  ;;  %v3441_v25 = vadd.f32 1.0, %v2662_v6  ;;  %v3444_v0 = vadd.f32 %v3093_v35, %v725_v2  ;;  %v615_v63 = vpop.f32.mrf.mxu0 }
  0xd5   : > { %v2666_v15 = vpop.eup %2665  ;;  %vm1384_vm2 = vweird.f32 %v3250_v19  ;;  %vm1385_vm3 = vweird.f32 %v3323_v3  ;;  %v1390_v16 = vand.u32 2147483648, %v3250_v19  ;;  %2667 = vrcp.f32 %v3414_v40 }
  0xd6   : > { %v3451_v28 = vmul.f32 %v1497_v14, %v3128_v60  ;;  %v1726_v31 = vsub.f32 1.0, %v1725_v10  ;;  %v1500_v30 = vmul.f32 %v3423_v49, %v3348_v26  ;;  %2669 = vrcp.f32 %v3421_v21  ;;  %vm3461_vm4 = vmor %vm1384_vm2, %vm1385_vm3  ;;  %v728_v14 = vpop.f32.mrf.mxu3 }
  0xd7   : > { %v1062_v18 = vsel %vm3410_vm0, %v1061_v8, %v1057_v24  ;;  %v1383_v36 = vadd.f32 %v3323_v3, %v1382_v54  ;;  %v1735_v39 = vand.u32 2147483648, %v3310_v5  ;;  %2671 = vrcp.f32 %v3435_v20 }
  0xd8   : > { %vm3465_vm5 = vcmp.eq.f32.partialorder %v1388_v12, 8.507059e+37  ;;  %v1510_v41 = vand.u32 2147483648, %v3348_v26  ;;  %2673 = vrcp.f32 %v3441_v25  ;;  %v3471_v42 = vadd.f32 1.0, %v2666_v15 }
  0xd9   : > { %v1391_v33 = vor.u32 1.1754944e-38, %v1390_v16  ;;  %vm1729_vm6 = vweird.f32 %v3310_v5  ;;  %v1733_v50 = vand.u32 2147483647, %v3310_v5  ;;  %v2493_v45 = vmul.f32 -1.442695, %v3444_v0 }
  0xda   : > { %v3477_v55 = vmul.f32 %v1062_v18, %v3134_v1  ;;  %v1727_v52 = vmul.f32 %v3396_v4, %v1726_v31  ;;  %v1501_v48 = vsub.f32 1.0, %v1500_v30  ;;  %v1508_v23 = vand.u32 2147483647, %v3348_v26 }
  0xdb   : > { %v3481_v58 = vpop.eup %2667  ;;  %v1387_v59 = vsel %vm3461_vm4, %v3323_v3, %v1383_v36  ;;  %v1736_v62 = vor.u32 1.1754944e-38, %v1735_v39  ;;  %vm1504_vm7 = vweird.f32 %v3348_v26  ;;  %v3488_v44 = vadd.f32 %v3093_v35, %v688_v38  ;;  %v670_v16 = vpop.f32.mrf.mxu1 }
  0xdc   : > { %5620 = vst [vmem:[#allocation9_spill] sm:$0xff] %v3477_v55  ;;  %v3490_v1 = vpop.eup %2669  ;;  %vm1730_vm8 = vweird.f32 %v3396_v4  ;;  %v3493_v9 = vor.u32 1.1754944e-38, %v1510_v41  ;;  %2675 = vrcp.f32 %v3471_v42  ;;  %v3497_v61 = vadd.f32 %v3093_v35, %v668_v56 }
  0xdd   : > { %v3499_v6 = vpop.eup %2671  ;;  %vm3501_vm9 = vcmp.eq.f32.partialorder %v1733_v50, 8.507059e+37  ;;  %v1073_v34 = vand.u32 2147483647, %v3414_v40  ;;  %v1075_v2 = vand.u32 2147483648, %v3414_v40  ;;  %v1403_v8 = vand.u32 2147483647, %v3421_v21  ;;  %vm3553_vm13 = vmor %vm1729_vm6, %vm1730_vm8 }
  0xde   : > { %v1405_v10 = vand.u32 2147483648, %v3421_v21  ;;  %v3509_v17 = vpop.eup %2673  ;;  %v1392_v54 = vsel %vm3465_vm5, %v1391_v33, %v1387_v59  ;;  %v1728_v24 = vadd.f32 %v3396_v4, %v1727_v52  ;;  %v1502_v12 = vmul.f32 %v3423_v49, %v1501_v48  ;;  %v690_v59 = vpop.f32.mrf.mxu2 }
  0xdf   : > { %vm3515_vm10 = vcmp.eq.f32.partialorder %v1508_v23, 8.507059e+37  ;;  %v3520_v15 = vadd.f32 %v3093_v35, %v615_v63  ;;  %v1065_v31 = vmul.f32 %v3481_v58, %v3414_v40  ;;  %v1395_v30 = vmul.f32 %v3490_v1, %v3421_v21 }
  0xe0   : > { %2677 = vpow2.f32 %v2493_v45  ;;  %v3527_v18 = vadd.f32 %v3093_v35, %v670_v16  ;;  %vm1505_vm11 = vweird.f32 %v3423_v49  ;;  %v1740_v36 = vmul.f32 %v3499_v6, %v3435_v20 }
  0xe1   : > { %v2470_v39 = vmul.f32 -1.442695, %v3497_v61  ;;  %v3534_v19 = vadd.f32 %v3093_v35, %v728_v14  ;;  %v3536_v60 = vor.u32 1.1754944e-38, %v1075_v2  ;;  %vm1399_vm12 = vweird.f32 %v3421_v21  ;;  %vm3568_vm0 = vmor %vm1504_vm7, %vm1505_vm11 }
  0xe2   : > { %v3539_v41 = vor.u32 1.1754944e-38, %v1405_v10  ;;  %v1515_v38 = vmul.f32 %v3509_v17, %v3441_v25  ;;  %v2478_v33 = vmul.f32 -1.442695, %v3488_v44  ;;  %v3544_v50 = vpop.eup %2675  ;;  %v3547_v45 = vmul.f32 %v1392_v54, %v3151_v13 }
  0xe3   : > { %v1503_v48 = vadd.f32 %v3423_v49, %v1502_v12  ;;  %vm1069_vm14 = vweird.f32 %v3414_v40  ;;  %vm1070_vm15 = vweird.f32 %v3481_v58  ;;  %v2449_v23 = vmul.f32 -1.442695, %v3520_v15 }
  0xe4   : > { %v1732_v13 = vsel %vm3553_vm13, %v3396_v4, %v1728_v24  ;;  %v1066_v63 = vsub.f32 1.0, %v1065_v31  ;;  %v1396_v2 = vsub.f32 1.0, %v1395_v30  ;;  %v2471_v10 = vmul.f32 -1.442695, %v3527_v18  ;;  %vm3618_vm7 = vmor %vm1069_vm14, %vm1070_vm15 }
  0xe5   : > { %v1741_v14 = vsub.f32 1.0, %v1740_v36  ;;  %vm1744_vm1 = vweird.f32 %v3435_v20  ;;  %2679 = vpow2.f32 %v2470_v39  ;;  %v2494_v54 = vmul.f32 -1.442695, %v3534_v19 }
  0xe6   : > { %v2678_v12 = vpop.eup %2677  ;;  %v1516_v4 = vsub.f32 1.0, %v1515_v38  ;;  %v1080_v24 = vmul.f32 %v3544_v50, %v3471_v42  ;;  %2681 = vpow2.f32 %v2478_v33  ;;  %v3578_v26 = vadd.f32 %v3093_v35, %v690_v59 }
  0xe7   : > { %v1737_v16 = vsel %vm3501_vm9, %v1736_v62, %v1732_v13  ;;  %v1507_v31 = vsel %vm3568_vm0, %v3423_v49, %v1503_v48  ;;  %v1748_v30 = vand.u32 2147483647, %v3435_v20  ;;  %2683 = vpow2.f32 %v2449_v23 }
  0xe8   : > { %v1067_v36 = vmul.f32 %v3481_v58, %v1066_v63  ;;  %v1397_v39 = vmul.f32 %v3490_v1, %v1396_v2  ;;  %vm1400_vm2 = vweird.f32 %v3490_v1  ;;  %2685 = vpow2.f32 %v2471_v10 }
  0xe9   : > { %vm3589_vm3 = vcmp.eq.f32.partialorder %v1403_v8, 8.507059e+37  ;;  %v1742_v62 = vmul.f32 %v3499_v6, %v1741_v14  ;;  %v1750_v3 = vand.u32 2147483648, %v3435_v20  ;;  %v3595_v33 = vadd.f32 1.0, %v2678_v12  ;;  %vm3632_vm9 = vmor %vm1399_vm12, %vm1400_vm2 }
  0xea   : > { %2687 = vpow2.f32 %v2494_v54  ;;  %v1512_v49 = vsel %vm3515_vm10, %v3493_v9, %v1507_v31  ;;  %v1517_v52 = vmul.f32 %v3509_v17, %v1516_v4  ;;  %v1081_v48 = vsub.f32 1.0, %v1080_v24  ;;  %v618_v24 = vpop.f32.mrf.mxu0 }
  0xeb   : > { %v2479_v23 = vmul.f32 -1.442695, %v3578_v26  ;;  %v2680_v8 = vpop.eup %2679  ;;  %vm3604_vm4 = vcmp.eq.f32.partialorder %v1073_v34, 8.507059e+37  ;;  %vm1745_vm5 = vweird.f32 %v3499_v6  ;;  %vm1519_vm6 = vweird.f32 %v3441_v25 }
  0xec   : > { %v1523_v13 = vand.u32 2147483647, %v3441_v25  ;;  %v2060_v9 = vpack.c.bf16 %v3451_v28, %v3386_v57  ;;  %v2682_v56 = vpop.eup %2681  ;;  %v1068_v5 = vadd.f32 %v3481_v58, %v1067_v36  ;;  %v1398_v63 = vadd.f32 %v3490_v1, %v1397_v39  ;;  %vm3646_vm11 = vmor %vm1744_vm1, %vm1745_vm5  ;;  %v693_v36 = vpop.f32.mrf.mxu2 }
  0xed   : > { %vm1520_vm8 = vweird.f32 %v3509_v17  ;;  %v1525_v2 = vand.u32 2147483648, %v3441_v25  ;;  %v2684_v10 = vpop.eup %2683  ;;  %v3626_v57 = vmul.f32 %v1737_v16, %v3170_v27  ;;  %v1743_v28 = vadd.f32 %v3499_v6, %v1742_v62 }
  0xee   : > { %vm3637_vm10 = vcmp.eq.f32.partialorder %v1748_v30, 8.507059e+37  ;;  %2689 = vrcp.f32 %v3595_v33  ;;  %2104 = vmatpush.bf16.msrb.mxu2 %v2060_v9  ;;  %v2686_v54 = vpop.eup %2685  ;;  %v1518_v21 = vadd.f32 %v3509_v17, %v1517_v52  ;;  %v1082_v12 = vmul.f32 %v3544_v50, %v1081_v48  ;;  %vm3661_vm12 = vmor %vm1519_vm6, %vm1520_vm8 }
  0xef   : > { %v3652_v4 = vadd.f32 1.0, %v2680_v8  ;;  %2691 = vpow2.f32 %v2479_v23  ;;  %v3655_v31 = vmul.f32 %v1512_v49, %v3194_v43  ;;  %v1751_v30 = vor.u32 1.1754944e-38, %v1750_v3  ;;  %v673_v49 = vpop.f32.mrf.mxu1 }
  0xf0   : > { %v2688_v16 = vpop.eup %2687  ;;  %vm3665_vm13 = vcmp.eq.f32.partialorder %v1523_v13, 8.507059e+37  ;;  %v3669_v39 = vadd.f32 1.0, %v2682_v56  ;;  %v1072_v43 = vsel %vm3618_vm7, %v3481_v58, %v1068_v5  ;;  %v1402_v62 = vsel %vm3632_vm9, %v3490_v1, %v1398_v63 }
  0xf1   : > { %5641 = vst [vmem:[#allocation10_spill] sm:$0xff] %v3655_v31  ;;  %v1526_v3 = vor.u32 1.1754944e-38, %v1525_v2  ;;  %v3677_v25 = vadd.f32 1.0, %v2684_v10  ;;  %v1747_v52 = vsel %vm3646_vm11, %v3499_v6, %v1743_v28  ;;  %vm1085_vm14 = vweird.f32 %v3544_v50 }
  0xf2   : > { %v3683_v48 = vadd.f32 1.0, %v2686_v54  ;;  %v3686_v23 = vadd.f32 %v3093_v35, %v618_v24  ;;  %v1522_v58 = vsel %vm3661_vm12, %v3509_v17, %v1518_v21  ;;  %v1083_v1 = vadd.f32 %v3544_v50, %v1082_v12  ;;  %v730_v12 = vpop.f32.mrf.mxu3 }
  0xf3   : > { %2693 = vrcp.f32 %v3652_v4  ;;  %v3693_v8 = vadd.f32 1.0, %v2688_v16  ;;  %vm1084_vm15 = vweird.f32 %v3471_v42  ;;  %v1088_v6 = vand.u32 2147483647, %v3471_v42 }
  0xf4   : > { %v3695_v13 = vpop.eup %2689  ;;  %v1090_v9 = vand.u32 2147483648, %v3471_v42  ;;  %2695 = vrcp.f32 %v3669_v39  ;;  %v1077_v17 = vsel %vm3604_vm4, %v3536_v60, %v1072_v43  ;;  %v1407_v5 = vsel %vm3589_vm3, %v3539_v41, %v1402_v62  ;;  %vm3714_vm0 = vmor %vm1084_vm15, %vm1085_vm14 }
  0xf5   : > { %v2692_v56 = vpop.eup %2691  ;;  %v1752_v34 = vsel %vm3637_vm10, %v1751_v30, %v1747_v52  ;;  %2697 = vrcp.f32 %v3677_v25  ;;  %v1527_v63 = vsel %vm3665_vm13, %v1526_v3, %v1522_v58  ;;  %v2450_v60 = vmul.f32 -1.442695, %v3686_v23 }
  0xf6   : > { %2699 = vrcp.f32 %v3683_v48  ;;  %v3721_v41 = vadd.f32 %v3093_v35, %v673_v49  ;;  %v1087_v38 = vsel %vm3714_vm0, %v3544_v50, %v1083_v1  ;;  %v1755_v59 = vmul.f32 %v3695_v13, %v3595_v33 }
  0xf7   : > { %v1765_v2 = vand.u32 2147483648, %v3595_v33  ;;  %2701 = vrcp.f32 %v3693_v8  ;;  %vm1089_vm1 = vcmp.eq.f32.partialorder %v1088_v6, 8.507059e+37  ;;  %v1091_v10 = vor.u32 1.1754944e-38, %v1090_v9  ;;  %v675_v3 = vpop.f32.mrf.mxu1 }
  0xf8   : > { %v1420_v40 = vand.u32 2147483648, %v3652_v4  ;;  %v3731_v28 = vadd.f32 1.0, %v2692_v56  ;;  %v3736_v54 = vmul.f32 %v1077_v17, %v3258_v22  ;;  %v3739_v50 = vmul.f32 %v1407_v5, %v3263_v29 }
  0xf9   : > { %v3733_v14 = vpop.eup %2693  ;;  %v3742_v27 = vmul.f32 %v1752_v34, %v3277_v46  ;;  %v1540_v21 = vand.u32 2147483648, %v3669_v39  ;;  %v3748_v16 = vmul.f32 %v1527_v63, %v3293_v51  ;;  %v3750_v30 = vsel %vm1089_vm1, %v1091_v10, %v1087_v38  ;;  %v620_v63 = vpop.f32.mrf.mxu0 }
  0xfa   : > { %5648 = vst [vmem:[#allocation11_spill] sm:$0xff] %v3736_v54  ;;  %v3745_v24 = vpop.eup %2695  ;;  %v1763_v22 = vand.u32 2147483647, %v3595_v33  ;;  %v1756_v43 = vsub.f32 1.0, %v1755_v59  ;;  %vm1759_vm2 = vweird.f32 %v3595_v33  ;;  %v3757_v46 = vor.u32 1.1754944e-38, %v1765_v2  ;;  %v733_v53 = vpop.f32.mrf.mxu3 }
  0xfb   : > { %5649 = vst [vmem:[#allocation12_spill] sm:$0xff] %v3742_v27  ;;  %v3754_v29 = vpop.eup %2697  ;;  %2703 = vpow2.f32 %v2450_v60  ;;  %v2472_v62 = vmul.f32 -1.442695, %v3721_v41  ;;  %v3762_v49 = vor.u32 1.1754944e-38, %v1420_v40  ;;  %v1538_v52 = vand.u32 2147483647, %v3669_v39 }
  0xfc   : > { %5650 = vst [vmem:[#allocation13_spill] sm:$0xff] %v3748_v16  ;;  %v3760_v51 = vpop.eup %2699  ;;  %2705 = vrcp.f32 %v3731_v28  ;;  %v3767_v58 = vadd.f32 %v3093_v35, %v730_v12  ;;  %v1410_v6 = vmul.f32 %v3733_v14, %v3652_v4  ;;  %vm1760_vm3 = vweird.f32 %v3695_v13 }
  0xfd   : > { %v3769_v1 = vpop.eup %2701  ;;  %v3774_v9 = vor.u32 1.1754944e-38, %v1540_v21  ;;  %v3777_v56 = vadd.f32 %v3093_v35, %v693_v36  ;;  %v1530_v17 = vmul.f32 %v3745_v24, %v3669_v39  ;;  %v1105_v34 = vand.u32 2147483648, %v3677_v25  ;;  %vm3828_vm11 = vmor %vm1759_vm2, %vm1760_vm3 }
  0xfe   : > { %v3784_v42 = vadd.f32 %v3093_v35, %v675_v3  ;;  %vm1414_vm4 = vweird.f32 %v3652_v4  ;;  %v1757_v60 = vmul.f32 %v3695_v13, %v1756_v43  ;;  %v1095_v38 = vmul.f32 %v3754_v29, %v3677_v25 }
  0xff   : > { %v1425_v59 = vmul.f32 %v3760_v51, %v3683_v48  ;;  %2707 = vpow2.f32 %v2472_v62  ;;  %vm1415_vm5 = vweird.f32 %v3733_v14  ;;  %vm1534_vm6 = vweird.f32 %v3669_v39 }
 0x100   : > { %v1435_v2 = vand.u32 2147483648, %v3683_v48  ;;  %v1770_v10 = vmul.f32 %v3769_v1, %v3693_v8  ;;  %v2495_v40 = vmul.f32 -1.442695, %v3767_v58  ;;  %v1411_v12 = vsub.f32 1.0, %v1410_v6  ;;  %vm3870_vm0 = vmor %vm1414_vm4, %vm1415_vm5 }
 0x101   : > { %v2704_v21 = vpop.eup %2703  ;;  %vm1429_vm7 = vweird.f32 %v3683_v48  ;;  %v2480_v36 = vmul.f32 -1.442695, %v3777_v56  ;;  %v3801_v43 = vadd.f32 %v3093_v35, %v620_v63  ;;  %vm3805_vm8 = vcmp.eq.f32.partialorder %v1763_v22, 8.507059e+37 }
 0x102   : > { %v3803_v62 = vpop.eup %2705  ;;  %v1531_v5 = vsub.f32 1.0, %v1530_v17  ;;  %v3809_v20 = vor.u32 1.1754944e-38, %v1105_v34  ;;  %v1433_v27 = vand.u32 2147483647, %v3683_v48  ;;  %v2473_v6 = vmul.f32 -1.442695, %v3784_v42 }
 0x103   : > { %v1758_v16 = vadd.f32 %v3695_v13, %v1757_v60  ;;  %vm1535_vm9 = vweird.f32 %v3745_v24  ;;  %v1096_v31 = vsub.f32 1.0, %v1095_v38  ;;  %v1426_v63 = vsub.f32 1.0, %v1425_v59  ;;  %v695_v38 = vpop.f32.mrf.mxu2 }
 0x104   : > { %v3815_v7 = vor.u32 1.1754944e-38, %v1435_v2  ;;  %v1771_v32 = vsub.f32 1.0, %v1770_v10  ;;  %v3817_v22 = vadd.f32 1.0, %v2704_v21  ;;  %2709 = vpow2.f32 %v2495_v40  ;;  %vm3891_vm4 = vmor %vm1534_vm6, %vm1535_vm9 }
 0x105   : > { %v2708_v17 = vpop.eup %2707  ;;  %v1412_v34 = vmul.f32 %v3733_v14, %v1411_v12  ;;  %vm1099_vm10 = vweird.f32 %v3677_v25  ;;  %v1545_v47 = vmul.f32 %v3803_v62, %v3731_v28  ;;  %2711 = vpow2.f32 %v2480_v36 }
 0x106   : > { %v2451_v60 = vmul.f32 -1.442695, %v3801_v43  ;;  %v1532_v2 = vmul.f32 %v3745_v24, %v1531_v5  ;;  %v1778_v10 = vand.u32 2147483647, %v3693_v8  ;;  %v1780_v40 = vand.u32 2147483648, %v3693_v8 }
 0x107   : > { %2713 = vpow2.f32 %v2473_v6  ;;  %v5655_v21 = vand.u32 2147483647, %v3652_v4  ;;  %v1762_v33 = vsel %vm3828_vm11, %v3695_v13, %v1758_v16  ;;  %vm3844_vm13 = vcmp.eq.f32.partialorder %v1538_v52, 8.507059e+37 }
 0x108   : > { %v1097_v5 = vmul.f32 %v3754_v29, %v1096_v31  ;;  %v1427_v54 = vmul.f32 %v3760_v51, %v1426_v63  ;;  %v3851_v6 = vadd.f32 %v3093_v35, %v733_v53  ;;  %vm3853_vm14 = vcmp.eq.f32.partialorder %v1433_v27, 8.507059e+37 }
 0x109   : > { %vm3837_vm12 = vcmp.eq.f32.partialorder %v5655_v21, 8.507059e+37  ;;  %v1772_v55 = vmul.f32 %v3769_v1, %v1771_v32  ;;  %2715 = vrcp.f32 %v3817_v22  ;;  %v3859_v13 = vadd.f32 1.0, %v2708_v17  ;;  %v3962_v17 = vld [vmem:[%s5542_s2] ss:$0 sm:$0xff] }
 0x10a   : > { %v3862_v16 = vadd.f32 %v3093_v35, %v695_v38  ;;  %v1413_v31 = vadd.f32 %v3733_v14, %v1412_v34  ;;  %vm1430_vm15 = vweird.f32 %v3760_v51  ;;  %v1546_v52 = vsub.f32 1.0, %v1545_v47  ;;  %v2710_v53 = vpop.eup %2709 }
 0x10b   : > { %2717 = vpow2.f32 %v2451_v60  ;;  %v1533_v27 = vadd.f32 %v3745_v24, %v1532_v2  ;;  %vm1100_vm1 = vweird.f32 %v3754_v29  ;;  %v5664_v35 = vand.u32 2147483647, %v3677_v25  ;;  %v2712_v47 = vpop.eup %2711 }
 0x10c   : > { %vm1774_vm3 = vweird.f32 %v3693_v8  ;;  %vm1775_vm11 = vweird.f32 %v3769_v1  ;;  %v1767_v4 = vsel %vm3805_vm8, %v3757_v46, %v1762_v33  ;;  %v1098_v34 = vadd.f32 %v3754_v29, %v1097_v5  ;;  %vm3906_vm8 = vmor %vm1429_vm7, %vm1430_vm15 }
 0x10d   : > { %vm3878_vm2 = vcmp.eq.f32.partialorder %v5664_v35, 8.507059e+37  ;;  %vm3896_vm5 = vcmp.eq.f32.partialorder %v1778_v10, 8.507059e+37  ;;  %v2496_v38 = vmul.f32 -1.442695, %v3851_v6  ;;  %v2714_v59 = vpop.eup %2713  ;;  %v1428_v3 = vadd.f32 %v3760_v51, %v1427_v54  ;;  %vm3918_vm6 = vmor %vm1774_vm3, %vm1775_vm11 }
 0x10e   : > { %v1773_v46 = vadd.f32 %v3769_v1, %v1772_v55  ;;  %2719 = vrcp.f32 %v3859_v13  ;;  %v2481_v2 = vmul.f32 -1.442695, %v3862_v16  ;;  %v1417_v10 = vsel %vm3870_vm0, %v3733_v14, %v1413_v31  ;;  %vm3934_vm7 = vmor %vm1099_vm10, %vm1100_vm1  ;;  %v623_v31 = vpop.f32.mrf.mxu0 }
 0x10f   : > { %v1781_v48 = vor.u32 1.1754944e-38, %v1780_v40  ;;  %v1547_v33 = vmul.f32 %v3803_v62, %v1546_v52  ;;  %v3923_v5 = vadd.f32 1.0, %v2710_v53  ;;  %v3925_v55 = vpop.eup %2715  ;;  %v1537_v35 = vsel %vm3891_vm4, %v3745_v24, %v1533_v27 }
 0x110   : > { %vm1549_vm9 = vweird.f32 %v3731_v28  ;;  %v1553_v14 = vand.u32 2147483647, %v3731_v28  ;;  %v3940_v40 = vadd.f32 1.0, %v2712_v47  ;;  %v1102_v24 = vsel %vm3934_vm7, %v3754_v29, %v1098_v34  ;;  %v735_v34 = vpop.f32.mrf.mxu3 }
 0x111   : > { %v2718_v52 = vpop.eup %2717  ;;  %vm1550_vm15 = vweird.f32 %v3803_v62  ;;  %v3946_v53 = vadd.f32 1.0, %v2714_v59  ;;  %2721 = vpow2.f32 %v2496_v38  ;;  %v1432_v25 = vsel %vm3906_vm8, %v3760_v51, %v1428_v3 }
 0x112   : > { %v1777_v32 = vsel %vm3918_vm6, %v3769_v1, %v1773_v46  ;;  %v1555_v27 = vand.u32 2147483648, %v3731_v28  ;;  %2723 = vpow2.f32 %v2481_v2  ;;  %v1548_v47 = vadd.f32 %v3803_v62, %v1547_v33  ;;  %vm3979_vm10 = vmor %vm1549_vm9, %vm1550_vm15 }
 0x113   : > { %v1110_v29 = vmul.f32 %v3925_v55, %v3817_v22  ;;  %2725 = vrcp.f32 %v3923_v5  ;;  %v3965_v51 = vadd.f32 %v3962_v17, %v623_v31  ;;  %v1422_v38 = vsel %vm3837_vm12, %v3762_v49, %v1417_v10 }
 0x114   : > { %v3967_v1 = vpop.eup %2719  ;;  %v1542_v59 = vsel %vm3844_vm13, %v3774_v9, %v1537_v35  ;;  %2727 = vrcp.f32 %v3940_v40  ;;  %v3984_v39 = vadd.f32 1.0, %v2718_v52  ;;  %v1107_v49 = vsel %vm3878_vm2, %v3809_v20, %v1102_v24 }
 0x115   : > { %v1437_v9 = vsel %vm3853_vm14, %v3815_v7, %v1432_v25  ;;  %vm3992_vm12 = vcmp.eq.f32.partialorder %v1553_v14, 8.507059e+37  ;;  %2729 = vrcp.f32 %v3946_v53  ;;  %v1782_v28 = vsel %vm3896_vm5, %v1781_v48, %v1777_v32 }
 0x116   : > { %v1556_v36 = vor.u32 1.1754944e-38, %v1555_v27  ;;  %v1120_v46 = vand.u32 2147483648, %v3817_v22  ;;  %v4001_v2 = vadd.f32 %v3962_v17, %v735_v34  ;;  %v1552_v7 = vsel %vm3979_vm10, %v3803_v62, %v1548_v47 }
 0x117   : > { %v2722_v20 = vpop.eup %2721  ;;  %v1111_v21 = vsub.f32 1.0, %v1110_v29  ;;  %v1440_v63 = vmul.f32 %v3967_v1, %v3859_v13  ;;  %v2452_v10 = vmul.f32 -1.442695, %v3965_v51  ;;  %v4011_v60 = vmul.f32 %v3750_v30, %v3321_v11 }
 0x118   : > { %5681 = vst [vmem:[#allocation14_spill] sm:$0xff] %v4001_v2  ;;  %v2724_v54 = vpop.eup %2723  ;;  %v4014_v48 = vmul.f32 %v1422_v38, %v3497_v61  ;;  %v4017_v33 = vmul.f32 %v1767_v4, %v3444_v0  ;;  %2731 = vrcp.f32 %v3984_v39  ;;  %v4023_v35 = vmul.f32 %v1542_v59, %v3488_v44  ;;  %v698_v61 = vpop.f32.mrf.mxu2 }
 0x119   : > { %v4020_v62 = vpop.eup %2725  ;;  %v4026_v8 = vmul.f32 %v1107_v49, %v3520_v15  ;;  %v4029_v14 = vmul.f32 %v1437_v9, %v3527_v18  ;;  %v1118_v11 = vand.u32 2147483647, %v3817_v22  ;;  %v4035_v0 = vmul.f32 %v1782_v28, %v3534_v19  ;;  %v625_v15 = vpop.f32.mrf.mxu0 }
 0x11a   : > { %5682 = vst [vmem:[#allocation15_spill] sm:$0xff] %v4017_v33  ;;  %v4032_v30 = vpop.eup %2727  ;;  %v1557_v4 = vsel %vm3992_vm12, %v1556_v36, %v1552_v7  ;;  %vm1114_vm13 = vweird.f32 %v3817_v22  ;;  %v2497_v44 = vmul.f32 -1.442695, %v4001_v2  ;;  %v1112_v18 = vmul.f32 %v3925_v55, %v1111_v21 }
 0x11b   : > { %5683 = vst [vmem:[#allocation16_spill] sm:$0xff] %v4023_v35  ;;  %v4041_v31 = vpop.eup %2729  ;;  %v1121_v52 = vor.u32 1.1754944e-38, %v1120_v46  ;;  %v1441_v24 = vsub.f32 1.0, %v1440_v63  ;;  %2733 = vpow2.f32 %v2452_v10  ;;  %vm1444_vm14 = vweird.f32 %v3859_v13 }
 0x11c   : > { %5684 = vst [vmem:[#allocation17_spill] sm:$0xff] %v4035_v0  ;;  %v1448_v19 = vand.u32 2147483647, %v3859_v13  ;;  %v1450_v25 = vand.u32 2147483648, %v3859_v13  ;;  %v4048_v32 = vadd.f32 %v3962_v17, %v698_v61  ;;  %v4051_v27 = vmul.f32 %v1557_v4, %v3578_v26 }
 0x11d   : > { %vm4053_vm0 = vcmp.eq.f32.partialorder %v1118_v11, 8.507059e+37  ;;  %v1785_v29 = vmul.f32 %v4020_v62, %v3923_v5  ;;  %v4059_v34 = vadd.f32 1.0, %v2722_v20  ;;  %v4062_v38 = vadd.f32 %v3962_v17, %v625_v15 }
 0x11e   : > { %5685 = vst [vmem:[#allocation18_spill] sm:$0xff] %v4048_v32  ;;  %v4064_v59 = vpop.eup %2731  ;;  %v1560_v3 = vmul.f32 %v4032_v30, %v3940_v40  ;;  %v1455_v26 = vmul.f32 %v4041_v31, %v3946_v53  ;;  %v4070_v49 = vadd.f32 1.0, %v2724_v54  ;;  %2735 = vpow2.f32 %v2497_v44 }
 0x11f   : > { %5686 = vst [vmem:[#allocation19_spill] sm:$0xff] %v4051_v27  ;;  %v1113_v9 = vadd.f32 %v3925_v55, %v1112_v18  ;;  %vm1115_vm1 = vweird.f32 %v3925_v55  ;;  %v1442_v12 = vmul.f32 %v3967_v1, %v1441_v24  ;;  %v1795_v28 = vand.u32 2147483648, %v3923_v5 }
 0x120   : > { %5689 = vst [vmem:[#allocation20_spill] sm:$0xff] %v4062_v38  ;;  %vm1445_vm2 = vweird.f32 %v3967_v1  ;;  %vm4077_vm3 = vcmp.eq.f32.partialorder %v1448_v19, 8.507059e+37  ;;  %v1451_v46 = vor.u32 1.1754944e-38, %v1450_v25  ;;  %v2482_v20 = vmul.f32 -1.442695, %v4048_v32  ;;  %vm4089_vm4 = vmor %vm1114_vm13, %vm1115_vm1 }
 0x121   : > { %v2734_v7 = vpop.eup %2733  ;;  %v1786_v21 = vsub.f32 1.0, %v1785_v29  ;;  %vm1789_vm11 = vweird.f32 %v3923_v5  ;;  %v1570_v63 = vand.u32 2147483648, %v3940_v40  ;;  %v1125_v10 = vmul.f32 %v4064_v59, %v3984_v39  ;;  %vm4106_vm5 = vmor %vm1444_vm14, %vm1445_vm2 }
 0x122   : > { %2737 = vrcp.f32 %v4059_v34  ;;  %v1793_v11 = vand.u32 2147483647, %v3923_v5  ;;  %v1561_v61 = vsub.f32 1.0, %v1560_v3  ;;  %v1456_v4 = vsub.f32 1.0, %v1455_v26  ;;  %v738_v3 = vpop.f32.mrf.mxu3 }
 0x123   : > { %2739 = vrcp.f32 %v4070_v49  ;;  %v1117_v44 = vsel %vm4089_vm4, %v3925_v55, %v1113_v9  ;;  %v1443_v15 = vadd.f32 %v3967_v1, %v1442_v12  ;;  %v4099_v18 = vor.u32 1.1754944e-38, %v1795_v28 }
 0x124   : > { %v1568_v22 = vand.u32 2147483647, %v3940_v40  ;;  %v2736_v24 = vpop.eup %2735  ;;  %vm1564_vm8 = vweird.f32 %v3940_v40  ;;  %v1133_v25 = vand.u32 2147483647, %v3984_v39  ;;  %v1135_v55 = vand.u32 2147483648, %v3984_v39 }
 0x125   : > { %v4113_v29 = vadd.f32 1.0, %v2734_v7  ;;  %v1787_v26 = vmul.f32 %v4020_v62, %v1786_v21  ;;  %v4116_v9 = vor.u32 1.1754944e-38, %v1570_v63  ;;  %v1126_v12 = vsub.f32 1.0, %v1125_v10  ;;  %v700_v10 = vpop.f32.mrf.mxu2 }
 0x126   : > { %2741 = vpow2.f32 %v2482_v20  ;;  %v1122_v13 = vsel %vm4053_vm0, %v1121_v52, %v1117_v44  ;;  %vm1790_vm6 = vweird.f32 %v4020_v62  ;;  %v1562_v28 = vmul.f32 %v4032_v30, %v1561_v61 }
 0x127   : > { %v1457_v54 = vmul.f32 %v4041_v31, %v1456_v4  ;;  %v1447_v7 = vsel %vm4106_vm5, %v3967_v1, %v1443_v15  ;;  %vm4128_vm7 = vcmp.eq.f32.partialorder %v1793_v11, 8.507059e+37  ;;  %vm1565_vm9 = vweird.f32 %v4032_v30  ;;  %vm4187_vm1 = vmor %vm1789_vm11, %vm1790_vm6 }
 0x128   : > { %v4123_v0 = vpop.eup %2737  ;;  %vm4133_vm15 = vcmp.eq.f32.partialorder %v1568_v22, 8.507059e+37  ;;  %vm1459_vm10 = vweird.f32 %v3946_v53  ;;  %v4138_v47 = vadd.f32 1.0, %v2736_v24  ;;  %vm1460_vm12 = vweird.f32 %v4041_v31  ;;  %vm4161_vm14 = vmor %vm1564_vm8, %vm1565_vm9 }
 0x129   : > { %v4140_v20 = vpop.eup %2739  ;;  %v1463_v1 = vand.u32 2147483647, %v3946_v53  ;;  %v1465_v63 = vand.u32 2147483648, %v3946_v53  ;;  %2743 = vrcp.f32 %v4113_v29  ;;  %v4147_v11 = vmul.f32 %v1122_v13, %v3686_v23  ;;  %vm4172_vm0 = vmor %vm1459_vm10, %vm1460_vm12 }
 0x12a   : > { %v1788_v61 = vadd.f32 %v4020_v62, %v1787_v26  ;;  %v1127_v4 = vmul.f32 %v4064_v59, %v1126_v12  ;;  %vm1129_vm13 = vweird.f32 %v3984_v39  ;;  %v4152_v44 = vor.u32 1.1754944e-38, %v1135_v55  ;;  %v628_v12 = vpop.f32.mrf.mxu0 }
 0x12b   : > { %5700 = vst [vmem:[#allocation21_spill] sm:$0xff] %v4147_v11  ;;  %v1452_v15 = vsel %vm4077_vm3, %v1451_v46, %v1447_v7  ;;  %v1563_v22 = vadd.f32 %v4032_v30, %v1562_v28  ;;  %v1458_v24 = vadd.f32 %v4041_v31, %v1457_v54  ;;  %v1800_v19 = vmul.f32 %v4123_v0, %v4059_v34 }
 0x12c   : > { %v2742_v55 = vpop.eup %2741  ;;  %v1575_v40 = vmul.f32 %v4140_v20, %v4070_v49  ;;  %2745 = vrcp.f32 %v4138_v47  ;;  %v2453_v46 = vmul.f32 -1.442695, %v4062_v38  ;;  %v4181_v26 = vadd.f32 %v3962_v17, %v738_v3 }
 0x12d   : > { %vm1130_vm2 = vweird.f32 %v4064_v59  ;;  %vm4192_vm3 = vcmp.eq.f32.partialorder %v1463_v1, 8.507059e+37  ;;  %v1466_v28 = vor.u32 1.1754944e-38, %v1465_v63  ;;  %v4197_v54 = vadd.f32 %v3962_v17, %v700_v10 }
 0x12e   : > { %v1792_v3 = vsel %vm4187_vm1, %v4020_v62, %v1788_v61  ;;  %v1128_v5 = vadd.f32 %v4064_v59, %v1127_v4  ;;  %vm4203_vm11 = vcmp.eq.f32.partialorder %v1133_v25, 8.507059e+37  ;;  %v1808_v38 = vand.u32 2147483647, %v4059_v34  ;;  %v740_v61 = vpop.f32.mrf.mxu3  ;;  %vm4247_vm5 = vmor %vm1129_vm13, %vm1130_vm2 }
 0x12f   : > { %v1810_v1 = vand.u32 2147483648, %v4059_v34  ;;  %v4209_v11 = vpop.eup %2743  ;;  %v1567_v63 = vsel %vm4161_vm14, %v4032_v30, %v1563_v22  ;;  %v1462_v62 = vsel %vm4172_vm0, %v4041_v31, %v1458_v24  ;;  %v4217_v10 = vadd.f32 1.0, %v2742_v55  ;;  %v703_v55 = vpop.f32.mrf.mxu2 }
 0x130   : > { %v4220_v25 = vadd.f32 %v3962_v17, %v628_v12  ;;  %v1801_v4 = vsub.f32 1.0, %v1800_v19  ;;  %v1576_v53 = vsub.f32 1.0, %v1575_v40  ;;  %2747 = vpow2.f32 %v2453_v46 }
 0x131   : > { %v2498_v32 = vmul.f32 -1.442695, %v4181_v26  ;;  %v2007_v2 = vmul.f32 %v1452_v15, %v3721_v41  ;;  %v1797_v30 = vsel %vm4128_vm7, %v4099_v18, %v1792_v3  ;;  %vm1804_vm4 = vweird.f32 %v4059_v34 }
 0x132   : > { %v2483_v31 = vmul.f32 -1.442695, %v4197_v54  ;;  %v4229_v22 = vpop.eup %2745  ;;  %v1467_v23 = vsel %vm4192_vm3, %v1466_v28, %v1462_v62  ;;  %v4233_v24 = vor.u32 1.1754944e-38, %v1810_v1  ;;  %v1140_v19 = vmul.f32 %v4209_v11, %v4113_v29 }
 0x133   : > { %v4238_v41 = vadd.f32 %v3962_v17, %v740_v61  ;;  %v1572_v18 = vsel %vm4133_vm15, %v4116_v9, %v1567_v63  ;;  %vm1579_vm8 = vweird.f32 %v4070_v49  ;;  %2749 = vrcp.f32 %v4217_v10 }
 0x134   : > { %v2454_v15 = vmul.f32 -1.442695, %v4220_v25  ;;  %v1132_v52 = vsel %vm4247_vm5, %v4064_v59, %v1128_v5  ;;  %v1802_v9 = vmul.f32 %v4123_v0, %v1801_v4  ;;  %vm4258_vm6 = vcmp.eq.f32.partialorder %v1808_v38, 8.507059e+37  ;;  %v630_v4 = vpop.f32.mrf.mxu0 }
 0x135   : > { %v1577_v39 = vmul.f32 %v4140_v20, %v1576_v53  ;;  %2751 = vpow2.f32 %v2498_v32  ;;  %v2008_v40 = vmul.f32 %v1467_v23, %v3784_v42  ;;  %vm1805_vm7 = vweird.f32 %v4123_v0 }
 0x136   : > { %v1815_v46 = vmul.f32 %v4229_v22, %v4138_v47  ;;  %2753 = vpow2.f32 %v2483_v31  ;;  %v2748_v12 = vpop.eup %2747  ;;  %vm1580_vm9 = vweird.f32 %v4140_v20  ;;  %v1141_v59 = vsub.f32 1.0, %v1140_v19  ;;  %vm4283_vm15 = vmor %vm1804_vm4, %vm1805_vm7 }
 0x137   : > { %v2499_v38 = vmul.f32 -1.442695, %v4238_v41  ;;  %v4270_v13 = vadd.f32 %v3962_v17, %v703_v55  ;;  %v1137_v32 = vsel %vm4203_vm11, %v4152_v44, %v1132_v52  ;;  %v1583_v42 = vand.u32 2147483647, %v4070_v49  ;;  %vm4298_vm10 = vmor %vm1579_vm8, %vm1580_vm9 }
 0x138   : > { %v1585_v28 = vand.u32 2147483648, %v4070_v49  ;;  %2755 = vpow2.f32 %v2454_v15  ;;  %v4278_v3 = vmul.f32 %v1797_v30, %v3767_v58  ;;  %v1803_v5 = vadd.f32 %v4123_v0, %v1802_v9  ;;  %v705_v49 = vpop.f32.mrf.mxu2 }
 0x139   : > { %v1578_v63 = vadd.f32 %v4140_v20, %v1577_v39  ;;  %v1148_v44 = vand.u32 2147483647, %v4113_v29  ;;  %v4289_v7 = vpop.eup %2749  ;;  %v4292_v62 = vmul.f32 %v1572_v18, %v3777_v56  ;;  %v1816_v34 = vsub.f32 1.0, %v1815_v46 }
 0x13a   : > { %5715 = vst [vmem:[#allocation22_spill] sm:$0xff] %v4278_v3  ;;  %v4302_v61 = vadd.f32 1.0, %v2748_v12  ;;  %v2059_v53 = vpack.c.bf16 %v2008_v40, %v2007_v2  ;;  %v4305_v31 = vmul.f32 %v1137_v32, %v3801_v43  ;;  %v1142_v56 = vmul.f32 %v4209_v11, %v1141_v59 }
 0x13b   : > { %5718 = vst [vmem:[#allocation23_spill] sm:$0xff] %v4292_v62  ;;  %v2752_v30 = vpop.eup %2751  ;;  %2757 = vpow2.f32 %v2499_v38  ;;  %v2484_v23 = vmul.f32 -1.442695, %v4270_v13  ;;  %vm4309_vm12 = vcmp.eq.f32.partialorder %v1583_v42, 8.507059e+37  ;;  %v1586_v18 = vor.u32 1.1754944e-38, %v1585_v28 }
 0x13c   : > { %v2754_v19 = vpop.eup %2753  ;;  %vm1144_vm13 = vweird.f32 %v4113_v29  ;;  %v1150_v21 = vand.u32 2147483648, %v4113_v29  ;;  %2105 = vmatpush.bf16.msrb.mxu2 %v2059_v53  ;;  %v1807_v43 = vsel %vm4283_vm15, %v4123_v0, %v1803_v5  ;;  %v1582_v2 = vsel %vm4298_vm10, %v4140_v20, %v1578_v63 }
 0x13d   : > { %vm1145_vm14 = vweird.f32 %v4209_v11  ;;  %vm4322_vm0 = vcmp.eq.f32.partialorder %v1148_v44, 8.507059e+37  ;;  %v1823_v55 = vand.u32 2147483647, %v4138_v47  ;;  %v1817_v9 = vmul.f32 %v4229_v22, %v1816_v34 }
 0x13e   : > { %v2756_v52 = vpop.eup %2755  ;;  %v1590_v39 = vmul.f32 %v4289_v7, %v4217_v10  ;;  %2759 = vrcp.f32 %v4302_v61  ;;  %v4331_v0 = vadd.f32 1.0, %v2752_v30  ;;  %v1143_v20 = vadd.f32 %v4209_v11, %v1142_v56  ;;  %vm4355_vm3 = vmor %vm1144_vm13, %vm1145_vm14  ;;  %v743_v30 = vpop.f32.mrf.mxu3 }
 0x13f   : > { %v4334_v40 = vadd.f32 1.0, %v2754_v19  ;;  %2761 = vpow2.f32 %v2484_v23  ;;  %v2058_v46 = vpack.c.bf16 %v4029_v14, %v4014_v48  ;;  %v1812_v12 = vsel %vm4258_vm6, %v4233_v24, %v1807_v43 }
 0x140   : > { %v1151_v59 = vor.u32 1.1754944e-38, %v1150_v21  ;;  %vm1819_vm1 = vweird.f32 %v4138_v47  ;;  %v1825_v38 = vand.u32 2147483648, %v4138_v47  ;;  %v1587_v42 = vsel %vm4309_vm12, %v1586_v18, %v1582_v2 }
 0x141   : > { %v2758_v32 = vpop.eup %2757  ;;  %vm1820_vm2 = vweird.f32 %v4229_v22  ;;  %v4346_v28 = vadd.f32 1.0, %v2756_v52  ;;  %v4349_v5 = vadd.f32 %v3962_v17, %v630_v4  ;;  %2106 = vmatpush.bf16.msrb.mxu2 %v2058_v46  ;;  %v1818_v14 = vadd.f32 %v4229_v22, %v1817_v9  ;;  %v5737_v52 = vld [vmem:[#allocation6_spill] sm:$0xff]  ;;  %v5738_v9 = vld [vmem:[#allocation8_spill] sm:$0xff] }
 0x142   : > { %v1591_v24 = vsub.f32 1.0, %v1590_v39  ;;  %2763 = vrcp.f32 %v4331_v0  ;;  %v2057_v36 = vpack.c.bf16 %v3739_v50, %v3547_v45  ;;  %v1147_v1 = vsel %vm4355_vm3, %v4209_v11, %v1143_v20  ;;  %v633_v50 = vpop.f32.mrf.mxu0  ;;  %vm4387_vm5 = vmor %vm1819_vm1, %vm1820_vm2 }
 0x143   : > { %vm4366_vm11 = vcmp.eq.f32.partialorder %v1823_v55, 8.507059e+37  ;;  %v1598_v29 = vand.u32 2147483647, %v4217_v10  ;;  %2765 = vrcp.f32 %v4334_v40  ;;  %v4375_v58 = vmul.f32 %v1812_v12, %v3851_v6 }
 0x144   : > { %v4372_v44 = vpop.eup %2759  ;;  %v1826_v34 = vor.u32 1.1754944e-38, %v1825_v38  ;;  %vm1594_vm4 = vweird.f32 %v4217_v10  ;;  %v4378_v45 = vadd.f32 1.0, %v2758_v32  ;;  %v4381_v4 = vmul.f32 %v1587_v42, %v3862_v16 }
 0x145   : > { %5729 = vst [vmem:[#allocation24_spill] sm:$0xff] %v4375_v58  ;;  %v2762_v11 = vpop.eup %2761  ;;  %2767 = vrcp.f32 %v4346_v28  ;;  %v2455_v6 = vmul.f32 -1.442695, %v4349_v5  ;;  %2107 = vmatpush.bf16.msrb.mxu2 %v2057_v36  ;;  %v2068_v56 = vpack.c.bf16 %v3626_v57, %v3426_v37  ;;  %v1152_v16 = vsel %vm4322_vm0, %v1151_v59, %v1147_v1  ;;  %v708_v1 = vpop.f32.mrf.mxu2 }
 0x146   : > { %5730 = vst [vmem:[#allocation25_spill] sm:$0xff] %v4381_v4  ;;  %v1822_v47 = vsel %vm4387_vm5, %v4229_v22, %v1818_v14  ;;  %v1592_v23 = vmul.f32 %v4289_v7, %v1591_v24  ;;  %v1600_v19 = vand.u32 2147483648, %v4217_v10  ;;  %vm4402_vm8 = vcmp.eq.f32.partialorder %v1598_v29, 8.507059e+37  ;;  %v745_v48 = vpop.f32.mrf.mxu3 }
 0x147   : > { %v1155_v21 = vmul.f32 %v4372_v44, %v4302_v61  ;;  %2117 = vmatpush.bf16.msrb.mxu3 %v2068_v56  ;;  %vm1595_vm6 = vweird.f32 %v4289_v7  ;;  %2769 = vrcp.f32 %v4378_v45  ;;  %v4418_v55 = vadd.f32 1.0, %v2762_v11 }
 0x148   : > { %v4414_v15 = vpop.eup %2763  ;;  %v2056_v39 = vpack.c.bf16 %v5738_v9, %v5737_v52  ;;  %v1165_v46 = vand.u32 2147483648, %v4302_v61  ;;  %2771 = vpow2.f32 %v2455_v6  ;;  %v4430_v14 = vmul.f32 %v1152_v16, %v3965_v51  ;;  %vm4447_vm7 = vmor %vm1594_vm4, %vm1595_vm6 }
 0x149   : > { %v4422_v20 = vpop.eup %2765  ;;  %v1827_v24 = vsel %vm4366_vm11, %v1826_v34, %v1822_v47  ;;  %v1601_v36 = vor.u32 1.1754944e-38, %v1600_v19  ;;  %v1593_v53 = vadd.f32 %v4289_v7, %v1592_v23  ;;  %v1156_v6 = vsub.f32 1.0, %v1155_v21  ;;  %v5746_v47 = vld [vmem:[#allocation14_spill] sm:$0xff] }
 0x14a   : > { %2108 = vmatpush.bf16.msrb.mxu2 %v2056_v39  ;;  %v1163_v56 = vand.u32 2147483647, %v4302_v61  ;;  %v4441_v52 = vadd.f32 %v3962_v17, %v705_v49  ;;  %v1830_v63 = vmul.f32 %v4414_v15, %v4331_v0  ;;  %v1605_v34 = vmul.f32 %v4422_v20, %v4334_v40 }
 0x14b   : > { %v4436_v11 = vpop.eup %2767  ;;  %2773 = vrcp.f32 %v4418_v55  ;;  %v4457_v16 = vadd.f32 %v3962_v17, %v633_v50  ;;  %v4460_v23 = vmul.f32 %v1827_v24, %v5746_v47  ;;  %v4462_v19 = vor.u32 1.1754944e-38, %v1165_v46  ;;  %v635_v46 = vpop.f32.mrf.mxu0 }
 0x14c   : > { %v1840_v10 = vand.u32 2147483648, %v4331_v0  ;;  %v4466_v49 = vadd.f32 %v3962_v17, %v743_v30  ;;  %vm1159_vm9 = vweird.f32 %v4302_v61  ;;  %vm1834_vm15 = vweird.f32 %v4331_v0 }
 0x14d   : > { %5747 = vst [vmem:[#allocation6_spill] sm:$0xff] %v4460_v23  ;;  %v4468_v21 = vpop.eup %2769  ;;  %v1838_v9 = vand.u32 2147483647, %v4331_v0  ;;  %v1615_v50 = vand.u32 2147483648, %v4334_v40  ;;  %v1170_v39 = vmul.f32 %v4436_v11, %v4346_v28  ;;  %v1597_v30 = vsel %vm4447_vm7, %v4289_v7, %v1593_v53 }
 0x14e   : > { %5748 = vst [vmem:[#allocation8_spill] sm:$0xff] %v4466_v49  ;;  %v2772_v24 = vpop.eup %2771  ;;  %vm1160_vm10 = vweird.f32 %v4372_v44  ;;  %vm1609_vm12 = vweird.f32 %v4334_v40  ;;  %v1613_v47 = vand.u32 2147483647, %v4334_v40  ;;  %v2485_v29 = vmul.f32 -1.442695, %v4441_v52 }
 0x14f   : > { %v1157_v22 = vmul.f32 %v4372_v44, %v1156_v6  ;;  %v1831_v38 = vsub.f32 1.0, %v1830_v63  ;;  %v1606_v2 = vsub.f32 1.0, %v1605_v34  ;;  %v2456_v37 = vmul.f32 -1.442695, %v4457_v16  ;;  %vm4538_vm3 = vmor %vm1159_vm9, %vm1160_vm10 }
 0x150   : > { %v4485_v33 = vor.u32 1.1754944e-38, %v1840_v10  ;;  %v1845_v7 = vmul.f32 %v4468_v21, %v4378_v45  ;;  %v2500_v53 = vmul.f32 -1.442695, %v4466_v49  ;;  %v4491_v51 = vadd.f32 %v3962_v17, %v635_v46 }
 0x151   : > { %v4493_v32 = vpop.eup %2773  ;;  %v1602_v6 = vsel %vm4402_vm8, %v1601_v36, %v1597_v30  ;;  %vm4497_vm13 = vcmp.eq.f32.partialorder %v1163_v56, 8.507059e+37  ;;  %v4501_v34 = vor.u32 1.1754944e-38, %v1615_v50  ;;  %v1171_v10 = vsub.f32 1.0, %v1170_v39 }
 0x152   : > { %v4503_v42 = vadd.f32 1.0, %v2772_v24  ;;  %v1178_v35 = vand.u32 2147483647, %v4346_v28  ;;  %v1180_v49 = vand.u32 2147483648, %v4346_v28  ;;  %2775 = vpow2.f32 %v2485_v29 }
 0x153   : > { %v4508_v46 = vadd.f32 %v3962_v17, %v745_v48  ;;  %v1158_v18 = vadd.f32 %v4372_v44, %v1157_v22  ;;  %v1832_v36 = vmul.f32 %v4414_v15, %v1831_v38  ;;  %v1607_v56 = vmul.f32 %v4422_v20, %v1606_v2  ;;  %v5756_v38 = vld [vmem:[#allocation18_spill] sm:$0xff] }
 0x154   : > { %vm1174_vm14 = vweird.f32 %v4346_v28  ;;  %2777 = vpow2.f32 %v2456_v37  ;;  %vm4514_vm0 = vcmp.eq.f32.partialorder %v1838_v9, 8.507059e+37  ;;  %vm4518_vm1 = vcmp.eq.f32.partialorder %v1613_v47, 8.507059e+37 }
 0x155   : > { %5751 = vst [vmem:[#allocation14_spill] sm:$0xff] %v4508_v46  ;;  %v1846_v29 = vsub.f32 1.0, %v1845_v7  ;;  %v1620_v48 = vmul.f32 %v4493_v32, %v4418_v55  ;;  %2779 = vpow2.f32 %v2500_v53  ;;  %v2457_v22 = vmul.f32 -1.442695, %v4491_v51 }
 0x156   : > { %vm1835_vm2 = vweird.f32 %v4414_v15  ;;  %v1172_v2 = vmul.f32 %v4436_v11, %v1171_v10  ;;  %2781 = vrcp.f32 %v4503_v42  ;;  %v4529_v37 = vadd.f32 %v3962_v17, %v708_v1 }
 0x157   : > { %v4532_v9 = vmul.f32 %v1602_v6, %v5756_v38  ;;  %vm1610_vm11 = vweird.f32 %v4422_v20  ;;  %v1181_v30 = vor.u32 1.1754944e-38, %v1180_v49  ;;  %v2501_v47 = vmul.f32 -1.442695, %v4508_v46  ;;  %vm4558_vm5 = vmor %vm1834_vm15, %vm1835_vm2 }
 0x158   : > { %v1162_v1 = vsel %vm4538_vm3, %v4372_v44, %v1158_v18  ;;  %v1833_v7 = vadd.f32 %v4414_v15, %v1832_v36  ;;  %v1608_v53 = vadd.f32 %v4422_v20, %v1607_v56  ;;  %vm4549_vm4 = vcmp.eq.f32.partialorder %v1178_v35, 8.507059e+37  ;;  %v2776_v10 = vpop.eup %2775  ;;  %v748_v36 = vpop.f32.mrf.mxu3  ;;  %v5763_v35 = vld [vmem:[#allocation21_spill] sm:$0xff]  ;;  %vm4569_vm8 = vmor %vm1609_vm12, %vm1610_vm11 }
 0x159   : > { %v1853_v61 = vand.u32 2147483647, %v4378_v45  ;;  %v1847_v44 = vmul.f32 %v4468_v21, %v1846_v29  ;;  %v1621_v18 = vsub.f32 1.0, %v1620_v48  ;;  %2783 = vpow2.f32 %v2457_v22  ;;  %v710_v48 = vpop.f32.mrf.mxu2 }
 0x15a   : > { %v2778_v38 = vpop.eup %2777  ;;  %v1173_v0 = vadd.f32 %v4436_v11, %v1172_v2  ;;  %vm1175_vm6 = vweird.f32 %v4436_v11  ;;  %vm1849_vm7 = vweird.f32 %v4378_v45  ;;  %v2486_v29 = vmul.f32 -1.442695, %v4529_v37 }
 0x15b   : > { %v2780_v22 = vpop.eup %2779  ;;  %v1167_v56 = vsel %vm4497_vm13, %v4462_v19, %v1162_v1  ;;  %v1855_v40 = vand.u32 2147483648, %v4378_v45  ;;  %vm1624_vm9 = vweird.f32 %v4418_v55  ;;  %2785 = vpow2.f32 %v2501_v47  ;;  %vm4601_vm12 = vmor %vm1174_vm14, %vm1175_vm6 }
 0x15c   : > { %v4582_v46 = vpop.eup %2781  ;;  %v1837_v2 = vsel %vm4558_vm5, %v4414_v15, %v1833_v7  ;;  %vm1850_vm15 = vweird.f32 %v4468_v21  ;;  %vm4588_vm10 = vcmp.eq.f32.partialorder %v1853_v61, 8.507059e+37  ;;  %v4592_v12 = vadd.f32 1.0, %v2776_v10 }
 0x15d   : > { %v1612_v19 = vsel %vm4569_vm8, %v4422_v20, %v1608_v53  ;;  %v1848_v15 = vadd.f32 %v4468_v21, %v1847_v44  ;;  %v1622_v47 = vmul.f32 %v4493_v32, %v1621_v18  ;;  %v4607_v1 = vadd.f32 1.0, %v2778_v38  ;;  %v638_v44 = vpop.f32.mrf.mxu0  ;;  %v5770_v18 = vld [vmem:[#allocation20_spill] sm:$0xff]  ;;  %vm4632_vm14 = vmor %vm1849_vm7, %vm1850_vm15 }
 0x15e   : > { %v1177_v7 = vsel %vm4601_vm12, %v4436_v11, %v1173_v0  ;;  %v1628_v20 = vand.u32 2147483647, %v4418_v55  ;;  %v1630_v53 = vand.u32 2147483648, %v4418_v55  ;;  %2787 = vpow2.f32 %v2486_v29 }
 0x15f   : > { %v2784_v28 = vpop.eup %2783  ;;  %v1856_v61 = vor.u32 1.1754944e-38, %v1855_v40  ;;  %vm1625_vm13 = vweird.f32 %v4493_v32  ;;  %v1185_v10 = vmul.f32 %v4582_v46, %v4503_v42  ;;  %v4617_v49 = vadd.f32 1.0, %v2780_v22 }
 0x160   : > { %v4620_v38 = vmul.f32 %v1167_v56, %v5770_v18  ;;  %v1842_v11 = vsel %vm4514_vm0, %v4485_v33, %v1837_v2  ;;  %v1617_v24 = vsel %vm4518_vm1, %v4501_v34, %v1612_v19  ;;  %2789 = vrcp.f32 %v4592_v12  ;;  %vm4646_vm0 = vmor %vm1624_vm9, %vm1625_vm13  ;;  %v4666_v40 = vpop.f32.mrf.mxu3 }
 0x161   : > { %v2786_v56 = vpop.eup %2785  ;;  %v1182_v29 = vsel %vm4549_vm4, %v1181_v30, %v1177_v7  ;;  %v1852_v33 = vsel %vm4632_vm14, %v4468_v21, %v1848_v15  ;;  %v1623_v34 = vadd.f32 %v4493_v32, %v1622_v47  ;;  %2791 = vrcp.f32 %v4607_v1  ;;  %v713_v15 = vpop.f32.mrf.mxu2 }
 0x162   : > { %vm4650_vm1 = vcmp.eq.f32.partialorder %v1628_v20, 8.507059e+37  ;;  %v1631_v39 = vor.u32 1.1754944e-38, %v1630_v53  ;;  %v4654_v30 = vadd.f32 1.0, %v2784_v28  ;;  %v4657_v6 = vadd.f32 %v3962_v17, %v748_v36 }
 0x163   : > { %v4660_v21 = vmul.f32 %v1842_v11, %v4181_v26  ;;  %v4663_v22 = vmul.f32 %v1617_v24, %v4197_v54  ;;  %v1186_v55 = vsub.f32 1.0, %v1185_v10  ;;  %2793 = vrcp.f32 %v4617_v49 }
 0x164   : > { %5777 = vst [vmem:[#allocation18_spill] sm:$0xff] %v4657_v6  ;;  %v2788_v2 = vpop.eup %2787  ;;  %v4669_v19 = vmul.f32 %v1182_v29, %v4220_v25  ;;  %v1857_v63 = vsel %vm4588_vm10, %v1856_v61, %v1852_v33  ;;  %v4673_v36 = vadd.f32 1.0, %v2786_v56  ;;  %v4676_v26 = vadd.f32 %v3962_v17, %v638_v44 }
 0x165   : > { %5778 = vst [vmem:[#allocation21_spill] sm:$0xff] %v4660_v21  ;;  %v1627_v54 = vsel %vm4646_vm0, %v4493_v32, %v1623_v34  ;;  %vm1189_vm2 = vweird.f32 %v4503_v42  ;;  %v1193_v47 = vand.u32 2147483647, %v4503_v42  ;;  %v1195_v25 = vand.u32 2147483648, %v4503_v42  ;;  %v640_v18 = vpop.f32.mrf.mxu0 }
 0x166   : > { %v4685_v7 = vadd.f32 %v3962_v17, %v713_v15  ;;  %v4687_v27 = vpop.eup %2789  ;;  %2795 = vrcp.f32 %v4654_v30  ;;  %v2502_v20 = vmul.f32 -1.442695, %v4657_v6  ;;  %v4692_v53 = vadd.f32 %v3962_v17, %v710_v48 }
 0x167   : > { %v2458_v32 = vmul.f32 -1.442695, %v4676_v26  ;;  %v4695_v28 = vpop.eup %2791  ;;  %v4698_v61 = vmul.f32 %v1857_v63, %v4238_v41  ;;  %v1187_v10 = vmul.f32 %v4582_v46, %v1186_v55  ;;  %v4701_v44 = vadd.f32 1.0, %v2788_v2 }
 0x168   : > { %v1632_v24 = vsel %vm4650_vm1, %v1631_v39, %v1627_v54  ;;  %v1870_v48 = vand.u32 2147483648, %v4617_v49  ;;  %2797 = vrcp.f32 %v4673_v36  ;;  %v2488_v0 = vmul.f32 -1.442695, %v4685_v7  ;;  %v4728_v63 = vpop.f32.mrf.mxu3 }
 0x169   : > { %5779 = vst [vmem:[#allocation20_spill] sm:$0xff] %v4698_v61  ;;  %v4710_v56 = vpop.eup %2793  ;;  %2799 = vpow2.f32 %v2458_v32  ;;  %v4713_v41 = vadd.f32 %v3962_v17, %v640_v18  ;;  %v1635_v45 = vmul.f32 %v4687_v27, %v4592_v12  ;;  %v1200_v50 = vmul.f32 %v4695_v28, %v4607_v1 }
 0x16a   : > { %5780 = vst [vmem:[#allocation26_spill] sm:$0xff] %v4710_v56  ;;  %2801 = vpow2.f32 %v2502_v20  ;;  %v2487_v39 = vmul.f32 -1.442695, %v4692_v53  ;;  %v1188_v55 = vadd.f32 %v4582_v46, %v1187_v10  ;;  %vm1190_vm3 = vweird.f32 %v4582_v46 }
 0x16b   : > { %2803 = vrcp.f32 %v4701_v44  ;;  %v2459_v2 = vmul.f32 -1.442695, %v4713_v41  ;;  %vm4732_vm11 = vcmp.eq.f32.partialorder %v1193_v47, 8.507059e+37  ;;  %v1196_v32 = vor.u32 1.1754944e-38, %v1195_v25  ;;  %vm4747_vm4 = vmor %vm1189_vm2, %vm1190_vm3 }
 0x16c   : > { %v4730_v15 = vpop.eup %2795  ;;  %v1860_v20 = vmul.f32 %v4710_v56, %v4617_v49  ;;  %2805 = vpow2.f32 %v2488_v0  ;;  %v4739_v10 = vmul.f32 %v1632_v24, %v4270_v13  ;;  %v1645_v34 = vand.u32 2147483648, %v4592_v12 }
 0x16d   : > { %2807 = vpow2.f32 %v2459_v2  ;;  %v4751_v25 = vor.u32 1.1754944e-38, %v1870_v48  ;;  %v1636_v11 = vsub.f32 1.0, %v1635_v45  ;;  %v1201_v0 = vsub.f32 1.0, %v1200_v50 }
 0x16e   : > { %v4743_v29 = vpop.eup %2797  ;;  %2809 = vpow2.f32 %v2487_v39  ;;  %v1192_v24 = vsel %vm4747_vm4, %v4582_v46, %v1188_v55  ;;  %vm1639_vm5 = vweird.f32 %v4592_v12  ;;  %v1210_v2 = vand.u32 2147483648, %v4607_v1 }
 0x16f   : > { %5786 = vst [vmem:[#allocation27_spill] sm:$0xff] %v4751_v25  ;;  %v2800_v13 = vpop.eup %2799  ;;  %v1215_v42 = vmul.f32 %v4730_v15, %v4654_v30  ;;  %v1861_v33 = vsub.f32 1.0, %v1860_v20  ;;  %vm1864_vm8 = vweird.f32 %v4617_v49  ;;  %v1643_v48 = vand.u32 2147483647, %v4592_v12  ;;  %v715_v20 = vpop.f32.mrf.mxu2 }
 0x170   : > { %v2802_v18 = vpop.eup %2801  ;;  %v4762_v45 = vadd.f32 1.0, %v2800_v13  ;;  %vm1865_vm6 = vweird.f32 %v4710_v56  ;;  %v4769_v46 = vor.u32 1.1754944e-38, %v1645_v34  ;;  %vm1204_vm7 = vweird.f32 %v4607_v1 }
 0x171   : > { %v4766_v39 = vpop.eup %2803  ;;  %v1208_v55 = vand.u32 2147483647, %v4607_v1  ;;  %v1197_v3 = vsel %vm4732_vm11, %v1196_v32, %v1192_v24  ;;  %v1637_v13 = vmul.f32 %v4687_v27, %v1636_v11  ;;  %v1202_v58 = vmul.f32 %v4695_v28, %v1201_v0  ;;  %v4791_v0 = vpop.f32.mrf.mxu3  ;;  %vm4869_vm0 = vmor %vm1864_vm8, %vm1865_vm6 }
 0x172   : > { %v2806_v47 = vpop.eup %2805  ;;  %2811 = vrcp.f32 %v4762_v45  ;;  %v1211_v23 = vor.u32 1.1754944e-38, %v1210_v2  ;;  %v1885_v21 = vand.u32 2147483648, %v4673_v36  ;;  %v1216_v61 = vsub.f32 1.0, %v1215_v42 }
 0x173   : > { %v2808_v50 = vpop.eup %2807  ;;  %v1862_v25 = vmul.f32 %v4710_v56, %v1861_v33  ;;  %vm1640_vm9 = vweird.f32 %v4687_v27  ;;  %vm4782_vm15 = vcmp.eq.f32.partialorder %v1643_v48, 8.507059e+37  ;;  %v4789_v32 = vadd.f32 %v3962_v17, %v715_v20 }
 0x174   : > { %v2810_v6 = vpop.eup %2809  ;;  %v4786_v11 = vadd.f32 1.0, %v2808_v50  ;;  %v4794_v24 = vmul.f32 %v1197_v3, %v4349_v5  ;;  %vm1205_vm10 = vweird.f32 %v4695_v28  ;;  %vm4797_vm12 = vcmp.eq.f32.partialorder %v1208_v55, 8.507059e+37  ;;  %v4811_v5 = vpop.f32.mrf.mxu0  ;;  %vm4817_vm13 = vmor %vm1639_vm5, %vm1640_vm9 }
 0x175   : > { %v1650_v2 = vmul.f32 %v4766_v39, %v4701_v44  ;;  %v4803_v42 = vadd.f32 1.0, %v2806_v47  ;;  %v1638_v48 = vadd.f32 %v4687_v27, %v1637_v13  ;;  %v1203_v50 = vadd.f32 %v4695_v28, %v1202_v58  ;;  %vm4842_vm14 = vmor %vm1204_vm7, %vm1205_vm10 }
 0x176   : > { %v1875_v20 = vmul.f32 %v4743_v29, %v4673_v36  ;;  %v4809_v3 = vadd.f32 1.0, %v2802_v18  ;;  %v1217_v47 = vmul.f32 %v4730_v15, %v1216_v61  ;;  %v4822_v13 = vadd.f32 1.0, %v2810_v6 }
 0x177   : > { %2813 = vrcp.f32 %v4786_v11  ;;  %v4827_v58 = vadd.f32 %v3962_v17, %v4728_v63  ;;  %v4832_v34 = vadd.f32 %v4710_v56, %v1862_v25  ;;  %v4834_v12 = vor.u32 1.1754944e-38, %v1885_v21  ;;  %v4851_v21 = vld [vmem:[%s5542_s2] ss:$0 sm:$0xff] }
 0x178   : > { %v4829_v18 = vpop.eup %2811  ;;  %v1660_v59 = vand.u32 2147483648, %v4701_v44  ;;  %v2489_v62 = vmul.f32 -1.442695, %v4789_v32  ;;  %v1651_v17 = vsub.f32 1.0, %v1650_v2  ;;  %v4855_v63 = vadd.f32 %v4851_v21, %v4666_v40 }
 0x179   : > { %5793 = vst [vmem:[#allocation28_spill] sm:$0xff] %v4827_v58  ;;  %v1230_v61 = vmul.f32 %v4829_v18, %v4762_v45  ;;  %2815 = vrcp.f32 %v4803_v42  ;;  %v1642_v1 = vsel %vm4817_vm13, %v4687_v27, %v1638_v48  ;;  %v1207_v25 = vsel %vm4842_vm14, %v4695_v28, %v1203_v50  ;;  %v758_v4 = vpop.f32.mrf.mxu3 }
 0x17a   : > { %5794 = vst [vmem:[#allocation29_spill] sm:$0xff] %v4832_v34  ;;  %v1876_v2 = vsub.f32 1.0, %v1875_v20  ;;  %2817 = vrcp.f32 %v4809_v3  ;;  %v5799_v40 = vmov 0  ;;  %vm1220_vm1 = vweird.f32 %v4730_v15 }
 0x17b   : > { %5795 = vst [vmem:[#allocation30_spill] sm:$0xff] %v4834_v12  ;;  %v5800_v40 = vsel %vm4869_vm0, 4294967295, %v5799_v40  ;;  %v1218_v12 = vadd.f32 %v4730_v15, %v1217_v47  ;;  %2819 = vrcp.f32 %v4822_v13  ;;  %v2504_v27 = vmul.f32 -1.442695, %v4827_v58 }
 0x17c   : > { %5798 = vst [vmem:[#allocation31_spill] sm:$0xff] %v4855_v63  ;;  %v1223_v28 = vand.u32 2147483647, %v4654_v30  ;;  %v1225_v48 = vand.u32 2147483648, %v4654_v30  ;;  %v1231_v50 = vsub.f32 1.0, %v1230_v61  ;;  %2821 = vpow2.f32 %v2489_v62  ;;  %v4901_v6 = vpop.f32.mrf.mxu0 }
 0x17d   : > { %5801 = vst [vmem:[#allocation32_spill] sm:$0xff] %v5800_v40  ;;  %v4879_v20 = vpop.eup %2813  ;;  %v1652_v55 = vmul.f32 %v4766_v39, %v1651_v17  ;;  %vm1219_vm2 = vweird.f32 %v4654_v30  ;;  %v2503_v47 = vmul.f32 -1.442695, %v4855_v63  ;;  %v1212_v61 = vsel %vm4797_vm12, %v1211_v23, %v1207_v25 }
 0x17e   : > { %v4891_v62 = vor.u32 1.1754944e-38, %v1660_v59  ;;  %vm4895_vm3 = vmor %vm1219_vm2, %vm1220_vm1  ;;  %v1245_v30 = vmul.f32 %v4879_v20, %v4786_v11  ;;  %v4908_v33 = vsel %vm4782_vm15, %v4769_v46, %v1642_v1  ;;  %v4911_v59 = vmul.f32 %v4743_v29, %v1876_v2 }
 0x17f   : > { %v4903_v63 = vpop.eup %2815  ;;  %v1222_v23 = vsel %vm4895_vm3, %v4730_v15, %v1218_v12  ;;  %2823 = vpow2.f32 %v2504_v27  ;;  %vm1224_vm11 = vcmp.eq.f32.partialorder %v1223_v28, 8.507059e+37  ;;  %v1226_v58 = vor.u32 1.1754944e-38, %v1225_v48 }
 0x180   : > { %v4916_v25 = vpop.eup %2817  ;;  %v1232_v34 = vmul.f32 %v4829_v18, %v1231_v50  ;;  %v1246_v56 = vsub.f32 1.0, %v1245_v30  ;;  %v4922_v46 = vmul.f32 %v1212_v61, %v4457_v16  ;;  %v4925_v54 = vadd.f32 %v4766_v39, %v1652_v55 }
 0x181   : > { %v4919_v40 = vpop.eup %2819  ;;  %2825 = vpow2.f32 %v2503_v47  ;;  %v4929_v15 = vadd.f32 %v4851_v21, %v4791_v0  ;;  %v1227_v1 = vsel %vm1224_vm11, %v1226_v58, %v1222_v23  ;;  %v1680_v2 = vmul.f32 %v4903_v63, %v4803_v42 }
 0x182   : > { %v2822_v12 = vpop.eup %2821  ;;  %v1247_v27 = vmul.f32 %v4879_v20, %v1246_v56  ;;  %vm1250_vm4 = vweird.f32 %v4879_v20  ;;  %v1240_v16 = vand.u32 2147483648, %v4762_v45  ;;  %vm1249_vm5 = vweird.f32 %v4786_v11 }
 0x183   : > { %5804 = vst [vmem:[#allocation33_spill] sm:$0xff] %v4929_v15  ;;  %v1253_v28 = vand.u32 2147483647, %v4786_v11  ;;  %v1255_v48 = vand.u32 2147483648, %v4786_v11  ;;  %v1233_v0 = vadd.f32 %v4829_v18, %v1232_v34  ;;  %vm1235_vm8 = vweird.f32 %v4829_v18  ;;  %vm4951_vm7 = vmor %vm1249_vm5, %vm1250_vm4 }
 0x184   : > { %v1248_v58 = vadd.f32 %v4879_v20, %v1247_v27  ;;  %v4942_v50 = vadd.f32 1.0, %v2822_v12  ;;  %v4946_v56 = vmul.f32 %v4916_v25, %v4809_v3  ;;  %v1665_v47 = vmul.f32 %v4919_v40, %v4822_v13 }
 0x185   : > { %v2824_v55 = vpop.eup %2823  ;;  %vm1234_vm6 = vweird.f32 %v4762_v45  ;;  %v2505_v34 = vmul.f32 -1.442695, %v4929_v15  ;;  %v1238_v61 = vand.u32 2147483647, %v4762_v45  ;;  %v1681_v17 = vsub.f32 1.0, %v1680_v2  ;;  %v760_v2 = vpop.f32.mrf.mxu3 }
 0x186   : > { %v1252_v30 = vsel %vm4951_vm7, %v4879_v20, %v1248_v58  ;;  %2827 = vrcp.f32 %v4942_v50  ;;  %v4962_v12 = vmul.f32 %v1227_v1, %v4491_v51  ;;  %vm1669_vm9 = vweird.f32 %v4822_v13  ;;  %vm4968_vm15 = vmor %vm1234_vm6, %vm1235_vm8  ;;  %v4977_v1 = vpop.f32.mrf.mxu0 }
 0x187   : > { %v2826_v23 = vpop.eup %2825  ;;  %v1675_v27 = vand.u32 2147483648, %v4822_v13  ;;  %v1256_v45 = vor.u32 1.1754944e-38, %v1255_v48  ;;  %v1237_v20 = vsel %vm4968_vm15, %v4829_v18, %v1233_v0  ;;  %v1241_v58 = vor.u32 1.1754944e-38, %v1240_v16 }
 0x188   : > { %vm1254_vm10 = vcmp.eq.f32.partialorder %v1253_v28, 8.507059e+37  ;;  %v4975_v51 = vadd.f32 1.0, %v2824_v55  ;;  %vm1654_vm12 = vweird.f32 %v4701_v44  ;;  %vm1655_vm13 = vweird.f32 %v4766_v39 }
 0x189   : > { %v1666_v11 = vsub.f32 1.0, %v1665_v47  ;;  %v1257_v57 = vsel %vm1254_vm10, %v1256_v45, %v1252_v30  ;;  %2829 = vpow2.f32 %v2505_v34  ;;  %v4982_v48 = vadd.f32 %v4851_v21, %v758_v4 }
 0x18a   : > { %vm1239_vm14 = vcmp.eq.f32.partialorder %v1238_v61, 8.507059e+37  ;;  %v4984_v43 = vadd.f32 1.0, %v2826_v23  ;;  %v1682_v18 = vmul.f32 %v4903_v63, %v1681_v17  ;;  %v4988_v15 = vadd.f32 %v4851_v21, %v760_v2 }
 0x18b   : > { %5809 = vst [vmem:[#allocation34_spill] sm:$0xff] %v4982_v48  ;;  %vm1670_vm1 = vweird.f32 %v4919_v40  ;;  %v1242_v16 = vsel %vm1239_vm14, %v1241_v58, %v1237_v20  ;;  %vm1684_vm2 = vweird.f32 %v4803_v42  ;;  %v2506_v28 = vmul.f32 -1.442695, %v4982_v48  ;;  %vm5057_vm14 = vmor %vm1654_vm12, %vm1655_vm13 }
 0x18c   : > { %5810 = vst [vmem:[#allocation35_spill] sm:$0xff] %v4988_v15  ;;  %v2828_v0 = vpop.eup %2827  ;;  %v1688_v55 = vand.u32 2147483647, %v4803_v42  ;;  %v1690_v4 = vand.u32 2147483648, %v4803_v42  ;;  %v1994_v47 = vmul.f32 %v1257_v57, %v4713_v41  ;;  %2831 = vrcp.f32 %v4975_v51  ;;  %vm5030_vm6 = vmor %vm1669_vm9, %vm1670_vm1 }
 0x18d   : > { %v1667_v34 = vmul.f32 %v4919_v40, %v1666_v11  ;;  %vm1685_vm3 = vweird.f32 %v4903_v63  ;;  %v1695_v61 = vmul.f32 %v2828_v0, %v4942_v50  ;;  %2833 = vpow2.f32 %v2506_v28 }
 0x18e   : > { %v1993_v17 = vmul.f32 %v1242_v16, %v4676_v26  ;;  %v1683_v30 = vadd.f32 %v4903_v63, %v1682_v18  ;;  %v1705_v23 = vand.u32 2147483648, %v4942_v50  ;;  %v2507_v45 = vmul.f32 -1.442695, %v4988_v15  ;;  %vm5015_vm8 = vmor %vm1684_vm2, %vm1685_vm3 }
 0x18f   : > { %v2830_v2 = vpop.eup %2829  ;;  %v5811_v57 = vand.u32 2147483647, %v4701_v44  ;;  %v1696_v20 = vsub.f32 1.0, %v1695_v61  ;;  %vm1699_vm4 = vweird.f32 %v4942_v50  ;;  %vm1700_vm5 = vweird.f32 %v2828_v0 }
 0x190   : > { %v1703_v58 = vand.u32 2147483647, %v4942_v50  ;;  %v1673_v26 = vand.u32 2147483647, %v4822_v13  ;;  %v5021_v18 = vadd.f32 %v4851_v21, %v4811_v5  ;;  %v5023_v16 = vadd.f32 1.0, %v2830_v2  ;;  %vm5045_vm9 = vmor %vm1699_vm4, %vm1700_vm5 }
 0x191   : > { %vm5006_vm11 = vcmp.eq.f32.partialorder %v5811_v57, 8.507059e+37  ;;  %v2052_v28 = vpack.c.bf16 %v1994_v47, %v1993_v17  ;;  %v1668_v61 = vadd.f32 %v4919_v40, %v1667_v34  ;;  %v1676_v42 = vor.u32 1.1754944e-38, %v1675_v27  ;;  %v650_v34 = vpop.f32.mrf.mxu0 }
 0x192   : > { %2835 = vrcp.f32 %v4984_v43  ;;  %v1697_v15 = vmul.f32 %v2828_v0, %v1696_v20  ;;  %v5035_v48 = vpop.eup %2831  ;;  %vm1879_vm7 = vweird.f32 %v4673_v36  ;;  %vm5038_vm15 = vcmp.eq.f32.partialorder %v1688_v55, 8.507059e+37 }
 0x193   : > { %v1691_v47 = vor.u32 1.1754944e-38, %v1690_v4  ;;  %v1706_v27 = vor.u32 1.1754944e-38, %v1705_v23  ;;  %2837 = vpow2.f32 %v2507_v45  ;;  %2091 = vmatpush.bf16.msrb.mxu1 %v2052_v28  ;;  %v2834_v17 = vpop.eup %2833  ;;  %v1687_v55 = vsel %vm5015_vm8, %v4903_v63, %v1683_v30 }
 0x194   : > { %v1698_v2 = vadd.f32 %v2828_v0, %v1697_v15  ;;  %vm1704_vm10 = vcmp.eq.f32.partialorder %v1703_v58, 8.507059e+37  ;;  %2839 = vrcp.f32 %v5023_v16  ;;  %v2460_v4 = vmul.f32 -1.442695, %v5021_v18 }
 0x195   : > { %v5064_v23 = vadd.f32 %v4851_v21, %v4901_v6  ;;  %v5066_v45 = vadd.f32 1.0, %v2834_v17  ;;  %v2051_v63 = vpack.c.bf16 %v4962_v12, %v4922_v46  ;;  %v1672_v15 = vsel %vm5030_vm6, %v4919_v40, %v1668_v61 }
 0x196   : > { %vm1674_vm1 = vcmp.eq.f32.partialorder %v1673_v26, 8.507059e+37  ;;  %v1702_v44 = vsel %vm5045_vm9, %v2828_v0, %v1698_v2  ;;  %v5076_v30 = vadd.f32 %v4851_v21, %v650_v34  ;;  %v1692_v6 = vsel %vm5038_vm15, %v1691_v47, %v1687_v55 }
 0x197   : > { %v1707_v20 = vsel %vm1704_vm10, %v1706_v27, %v1702_v44  ;;  %2841 = vrcp.f32 %v5066_v45  ;;  %v5083_v46 = vadd.f32 %v4851_v21, %v4977_v1  ;;  %2092 = vmatpush.bf16.msrb.mxu1 %v2051_v63  ;;  %v1657_v40 = vsel %vm5057_vm14, %v4766_v39, %v4925_v54 }
 0x198   : > { %v5085_v12 = vpop.eup %2835  ;;  %v1891_v0 = vsub.f32 1.0, %v4946_v56  ;;  %v1920_v58 = vmul.f32 %v5035_v48, %v4975_v51  ;;  %v2024_v26 = vmul.f32 %v1707_v20, %v4789_v32  ;;  %v1677_v28 = vsel %vm1674_vm1, %v1676_v42, %v1672_v15 }
 0x199   : > { %v2838_v11 = vpop.eup %2837  ;;  %2843 = vpow2.f32 %v2460_v4  ;;  %v2461_v1 = vmul.f32 -1.442695, %v5064_v23  ;;  %v2050_v61 = vpack.c.bf16 %v4794_v24, %v4669_v19  ;;  %v5102_v39 = vmul.f32 %v4908_v33, %v4441_v52 }
 0x19a   : > { %v5098_v57 = vpop.eup %2839  ;;  %vm1880_vm12 = vweird.f32 %v4743_v29  ;;  %v2023_v54 = vmul.f32 %v1692_v6, %v4685_v7  ;;  %v2463_v32 = vmul.f32 -1.442695, %v5076_v30  ;;  %v5109_v56 = vadd.f32 %v4743_v29, %v4911_v59 }
 0x19b   : > { %v1662_v19 = vsel %vm5006_vm11, %v4891_v62, %v1657_v40  ;;  %v1905_v24 = vmul.f32 %v5085_v12, %v4984_v43  ;;  %v2462_v52 = vmul.f32 -1.442695, %v5083_v46  ;;  %2093 = vmatpush.bf16.msrb.mxu1 %v2050_v61  ;;  %v2022_v33 = vmul.f32 %v1677_v28, %v4692_v53  ;;  %v653_v62 = vpop.f32.mrf.mxu0  ;;  %vm5131_vm13 = vmor %vm1879_vm7, %vm1880_vm12 }
 0x19c   : > { %v1921_v42 = vsub.f32 1.0, %v1920_v58  ;;  %v5118_v7 = vadd.f32 1.0, %v2838_v11  ;;  %v2067_v5 = vpack.c.bf16 %v2024_v26, %v2023_v54  ;;  %v1892_v59 = vmul.f32 %v4916_v25, %v1891_v0 }
 0x19d   : > { %v5120_v47 = vpop.eup %2841  ;;  %v1935_v41 = vmul.f32 %v5098_v57, %v5023_v16  ;;  %2845 = vpow2.f32 %v2461_v1  ;;  %v2049_v13 = vpack.c.bf16 %v4620_v38, %v4430_v14  ;;  %v2021_v27 = vmul.f32 %v1662_v19, %v4529_v37 }
 0x19e   : > { %v1898_v34 = vand.u32 2147483647, %v4809_v3  ;;  %v1950_v17 = vmul.f32 %v5120_v47, %v5066_v45  ;;  %2847 = vpow2.f32 %v2463_v32  ;;  %2118 = vmatpush.bf16.msrb.mxu3 %v2067_v5  ;;  %v1882_v14 = vsel %vm5131_vm13, %v4743_v29, %v5109_v56  ;;  %v5879_v29 = vld [vmem:[#allocation18_spill] sm:$0xff] }
 0x19f   : > { %v2844_v55 = vpop.eup %2843  ;;  %v1900_v38 = vand.u32 2147483648, %v4809_v3  ;;  %v1906_v2 = vsub.f32 1.0, %v1905_v24  ;;  %2849 = vpow2.f32 %v2462_v52  ;;  %2094 = vmatpush.bf16.msrb.mxu1 %v2049_v13  ;;  %v1922_v37 = vmul.f32 %v5035_v48, %v1921_v42 }
 0x1a0   : > { %v1951_v50 = vsub.f32 1.0, %v1950_v17  ;;  %2851 = vrcp.f32 %v5118_v7  ;;  %v2066_v4 = vpack.c.bf16 %v2022_v33, %v2021_v27  ;;  %v5147_v63 = vadd.f32 %v4916_v25, %v1892_v59  ;;  %v5855_v27 = vld [vmem:[#allocation30_spill] sm:$0xff] }
 0x1a1   : > { %v1913_v15 = vand.u32 2147483647, %v4984_v43  ;;  %v1936_v44 = vsub.f32 1.0, %v1935_v41  ;;  %v2064_v6 = vpack.c.bf16 %v4663_v22, %v4532_v9  ;;  %v1915_v20 = vand.u32 2147483648, %v4984_v43 }
 0x1a2   : > { %vm1924_vm2 = vweird.f32 %v4975_v51  ;;  %v5154_v40 = vadd.f32 1.0, %v2844_v55  ;;  %v5157_v0 = vadd.f32 %v4851_v21, %v653_v62  ;;  %2119 = vmatpush.bf16.msrb.mxu3 %v2066_v4  ;;  %v1907_v26 = vmul.f32 %v5085_v12, %v1906_v2 }
 0x1a3   : > { %v2846_v58 = vpop.eup %2845  ;;  %v1928_v11 = vand.u32 2147483647, %v4975_v51  ;;  %v1930_v28 = vand.u32 2147483648, %v4975_v51  ;;  %v1952_v1 = vmul.f32 %v5120_v47, %v1951_v50  ;;  %v5826_v9 = vpack.c.bf16 %v4305_v31, %v5763_v35  ;;  %v655_v62 = vpop.f32.mrf.mxu0 }
 0x1a4   : > { %v2848_v22 = vpop.eup %2847  ;;  %vm1894_vm3 = vweird.f32 %v4809_v3  ;;  %vm1895_vm11 = vweird.f32 %v4916_v25  ;;  %v5169_v61 = vadd.f32 %v5035_v48, %v1922_v37  ;;  %vm1925_vm4 = vweird.f32 %v5035_v48 }
 0x1a5   : > { %2095 = vmatpush.bf16.msrb.mxu1 %v5826_v9  ;;  %v1958_v54 = vand.u32 2147483647, %v5066_v45  ;;  %v2065_v32 = vpack.c.bf16 %v5102_v39, %v4739_v10  ;;  %v2850_v19 = vpop.eup %2849  ;;  %vm1910_vm8 = vweird.f32 %v5085_v12  ;;  %v1937_v31 = vmul.f32 %v5098_v57, %v1936_v44  ;;  %v5840_v9 = vld [vmem:[#allocation11_spill] sm:$0xff] }
 0x1a6   : > { %vm1954_vm6 = vweird.f32 %v5066_v45  ;;  %vm1955_vm7 = vweird.f32 %v5120_v47  ;;  %v1960_v35 = vand.u32 2147483648, %v5066_v45  ;;  %v2852_v24 = vpop.eup %2851  ;;  %2853 = vrcp.f32 %v5154_v40 }
 0x1a7   : > { %vm1939_vm15 = vweird.f32 %v5023_v16  ;;  %v1943_v10 = vand.u32 2147483647, %v5023_v16  ;;  %v2464_v39 = vmul.f32 -1.442695, %v5157_v0  ;;  %2120 = vmatpush.bf16.msrb.mxu3 %v2065_v32  ;;  %v5827_v52 = vand.u32 2147483647, %v4673_v36  ;;  %vm5206_vm14 = vmor %vm1954_vm6, %vm1955_vm7 }
 0x1a8   : > { %v1945_v42 = vand.u32 2147483648, %v5023_v16  ;;  %v1953_v5 = vadd.f32 %v5120_v47, %v1952_v1  ;;  %v1965_v59 = vmul.f32 %v2852_v24, %v5118_v7  ;;  %v5194_v41 = vadd.f32 1.0, %v2848_v22  ;;  %vm5233_vm7 = vmor %vm1924_vm2, %vm1925_vm4 }
 0x1a9   : > { %vm5187_vm9 = vcmp.eq.f32.partialorder %v5827_v52, 8.507059e+37  ;;  %v5830_v13 = vpack.c.bf16 %v4026_v8, %v4011_v60  ;;  %vm1940_vm10 = vweird.f32 %v5098_v57  ;;  %v5200_v36 = vadd.f32 1.0, %v2846_v58  ;;  %v5848_v52 = vld [vmem:[#allocation23_spill] sm:$0xff] }
 0x1aa   : > { %vm5210_vm1 = vcmp.eq.f32.partialorder %v1958_v54, 8.507059e+37  ;;  %v5214_v55 = vadd.f32 1.0, %v2850_v19  ;;  %v5835_v60 = vand.u32 2147483647, %v4617_v49  ;;  %v1938_v2 = vadd.f32 %v5098_v57, %v1937_v31  ;;  %vm5255_vm4 = vmor %vm1939_vm15, %vm1940_vm10  ;;  %v5864_v49 = vld [vmem:[#allocation16_spill] sm:$0xff] }
 0x1ab   : > { %2096 = vmatpush.bf16.msrb.mxu1 %v5830_v13  ;;  %v1961_v37 = vor.u32 1.1754944e-38, %v1960_v35  ;;  %v1966_v45 = vsub.f32 1.0, %v1965_v59  ;;  %2855 = vpow2.f32 %v2464_v39  ;;  %vm1969_vm6 = vweird.f32 %v5118_v7  ;;  %2121 = vmatpush.bf16.msrb.mxu3 %v2064_v6  ;;  %v5847_v39 = vld [vmem:[#allocation25_spill] sm:$0xff]  ;;  %vm5277_vm10 = vmor %vm1894_vm3, %vm1895_vm11  ;;  %v5852_v59 = vld [vmem:[#allocation7_spill] sm:$0xff] }
 0x1ac   : > { %vm5218_vm12 = vcmp.eq.f32.partialorder %v5835_v60, 8.507059e+37  ;;  %v1973_v50 = vand.u32 2147483647, %v5118_v7  ;;  %v1975_v4 = vand.u32 2147483648, %v5118_v7  ;;  %v5227_v44 = vadd.f32 %v4851_v21, %v655_v62  ;;  %v5841_v21 = vld [vmem:[#allocation9_spill] sm:$0xff]  ;;  %v5244_v6 = vpop.eup %2853  ;;  %v5862_v60 = vld [vmem:[#allocation35_spill] sm:$0xff] }
 0x1ad   : > { %v1957_v58 = vsel %vm5206_vm14, %v5120_v47, %v1953_v5  ;;  %v1967_v1 = vmul.f32 %v2852_v24, %v1966_v45  ;;  %vm1970_vm5 = vweird.f32 %v2852_v24  ;;  %2857 = vrcp.f32 %v5194_v41  ;;  %v5853_v62 = vld [vmem:[#allocation5_spill] sm:$0xff]  ;;  %v5871_v47 = vld [vmem:[#allocation27_spill] sm:$0xff] }
 0x1ae   : > { %v5842_v22 = vpack.c.bf16 %v5840_v9, %v5841_v21  ;;  %v1908_v51 = vadd.f32 %v5085_v12, %v1907_v26  ;;  %vm5247_vm2 = vcmp.eq.f32.partialorder %v1928_v11, 8.507059e+37  ;;  %2859 = vrcp.f32 %v5214_v55  ;;  %vm1971_vm15 = vmor %vm1969_vm6, %vm1970_vm5 }
 0x1af   : > { %v2465_v32 = vmul.f32 -1.442695, %v5227_v44  ;;  %v1931_v19 = vor.u32 1.1754944e-38, %v1930_v28  ;;  %v1942_v26 = vsel %vm5255_vm4, %v5098_v57, %v1938_v2  ;;  %2861 = vrcp.f32 %v5200_v36 }
 0x1b0   : > { %2097 = vmatpush.bf16.msrb.mxu1 %v5842_v22  ;;  %v1968_v11 = vadd.f32 %v2852_v24, %v1967_v1  ;;  %v1946_v31 = vor.u32 1.1754944e-38, %v1945_v42  ;;  %v1962_v16 = vsel %vm5210_vm1, %v1961_v37, %v1957_v58  ;;  %v1976_v35 = vor.u32 1.1754944e-38, %v1975_v4  ;;  %v5863_v4 = vld [vmem:[#allocation19_spill] sm:$0xff]  ;;  %v5868_v22 = vld [vmem:[#allocation26_spill] sm:$0xff] }
 0x1b1   : > { %2863 = vpow2.f32 %v2465_v32  ;;  %v5849_v28 = vpack.c.bf16 %v5847_v39, %v5848_v52  ;;  %v2856_v5 = vpop.eup %2855  ;;  %v1927_v7 = vsel %vm5233_vm7, %v5035_v48, %v5169_v61  ;;  %vm1944_vm5 = vcmp.eq.f32.partialorder %v1943_v10, 8.507059e+37 }
 0x1b2   : > { %v1972_v42 = vsel %vm1971_vm15, %v2852_v24, %v1968_v11  ;;  %vm1974_vm14 = vcmp.eq.f32.partialorder %v1973_v50, 8.507059e+37  ;;  %v5854_v13 = vpack.c.bf16 %v5852_v59, %v5853_v62  ;;  %v1887_v17 = vsel %vm5187_vm9, %v5855_v27, %v1882_v14  ;;  %v5861_v14 = vld [vmem:[#allocation34_spill] sm:$0xff]  ;;  %v5376_v62 = vld [vmem:[%s5543_s3 + $0x8] sm:$0xff] }
 0x1b3   : > { %2122 = vmatpush.bf16.msrb.mxu3 %v5849_v28  ;;  %vm5856_vm3 = vweird.f32 %v4984_v43  ;;  %v1947_v61 = vsel %vm1944_vm5, %v1946_v31, %v1942_v26  ;;  %v1977_v24 = vsel %vm1974_vm14, %v1976_v35, %v1972_v42  ;;  %v5304_v10 = vadd.f32 1.0, %v2856_v5  ;;  %v5306_v53 = vpop.eup %2857  ;;  %v5874_v28 = vld [vmem:[#allocation13_spill] sm:$0xff]  ;;  %v5875_v5 = vld [vmem:[#allocation10_spill] sm:$0xff]  ;;  %v5878_v27 = vld [vmem:[#allocation8_spill] sm:$0xff] }
 0x1b4   : > { %2098 = vmatpush.bf16.msrb.mxu1 %v5854_v13  ;;  %vm5300_vm11 = vmor %vm5856_vm3, %vm1910_vm8  ;;  %vm5310_vm13 = vcmp.eq.f32.partialorder %v1898_v34, 8.507059e+37  ;;  %v2041_v33 = vmul.f32 %v1962_v16, %v5861_v14  ;;  %v2042_v2 = vmul.f32 %v1977_v24, %v5862_v60  ;;  %v5319_v37 = vpop.eup %2859  ;;  %v1901_v45 = vor.u32 1.1754944e-38, %v1900_v38  ;;  %v5866_v38 = vld [vmem:[#allocation33_spill] sm:$0xff]  ;;  %v5873_v16 = vld [vmem:[#allocation14_spill] sm:$0xff] }
 0x1b5   : > { %v1912_v56 = vsel %vm5300_vm11, %v5085_v12, %v1908_v51  ;;  %v1916_v50 = vor.u32 1.1754944e-38, %v1915_v20  ;;  %v1932_v34 = vsel %vm5247_vm2, %v1931_v19, %v1927_v7  ;;  %2865 = vrcp.f32 %v5304_v10  ;;  %v5331_v58 = vpop.eup %2861  ;;  %v5869_v51 = vld [vmem:[#allocation29_spill] sm:$0xff]  ;;  %v5877_v7 = vld [vmem:[#allocation31_spill] sm:$0xff] }
 0x1b6   : > { %v5865_v12 = vpack.c.bf16 %v5863_v4, %v5864_v49  ;;  %v1897_v3 = vsel %vm5277_vm10, %v4916_v25, %v5147_v63  ;;  %vm1914_vm8 = vcmp.eq.f32.partialorder %v1913_v15, 8.507059e+37  ;;  %v2040_v20 = vmul.f32 %v1947_v61, %v5866_v38  ;;  %v5355_v63 = vld [vmem:[%s5543_s3] sm:$0xff]  ;;  %v5872_v15 = vld [vmem:[#allocation28_spill] sm:$0xff] }
 0x1b7   : > { %v2076_v1 = vpack.c.bf16 %v2042_v2, %v2041_v33  ;;  %v2864_v9 = vpop.eup %2863  ;;  %v5870_v54 = vsel %vm4869_vm0, %v5868_v22, %v5869_v51  ;;  %v1917_v19 = vsel %vm1914_vm8, %v1916_v50, %v1912_v56  ;;  %v1260_v25 = vmul.f32 %v5244_v6, %v5154_v40 }
 0x1b8   : > { %2123 = vmatpush.bf16.msrb.mxu3 %v5865_v12  ;;  %v1872_v32 = vsel %vm5218_vm12, %v5871_v47, %v5870_v54  ;;  %v1305_v43 = vmul.f32 %v5306_v53, %v5194_v41  ;;  %v2039_v26 = vmul.f32 %v1932_v34, %v5872_v15  ;;  %v1290_v11 = vmul.f32 %v5319_v37, %v5214_v55 }
 0x1b9   : > { %v5360_v31 = vadd.f32 1.0, %v2864_v9  ;;  %2130 = vmatpush.bf16.msra.mxu1 %v2076_v1  ;;  %v2079_v8 = vunpack.c.l.b16 %v5355_v63  ;;  %v2036_v35 = vmul.f32 %v1887_v17, %v5873_v16  ;;  %v1902_v39 = vsel %vm5310_vm13, %v1901_v45, %v1897_v3 }
 0x1ba   : > { %v1275_v52 = vmul.f32 %v5331_v58, %v5200_v36  ;;  %v5876_v57 = vpack.c.bf16 %v5874_v28, %v5875_v5  ;;  %v2038_v42 = vmul.f32 %v1917_v19, %v5877_v7  ;;  %v2075_v59 = vpack.c.bf16 %v2040_v20, %v2039_v26  ;;  %v2612_v5 = vld [vmem:[%s5545_s5] ss:$0 sm:$0xff] }
 0x1bb   : > { %2867 = vrcp.f32 %v5360_v31  ;;  %v5378_v13 = vpop.eup %2865  ;;  %v2035_v17 = vmul.f32 %v1872_v32, %v5878_v27  ;;  %v1261_v48 = vsub.f32 1.0, %v1260_v25  ;;  %v1306_v61 = vsub.f32 1.0, %v1305_v43 }
 0x1bc   : > { %2124 = vmatpush.bf16.msrb.mxu3 %v5876_v57  ;;  %v2083_v24 = vpack.c.b16 %v2079_v8, %v2079_v8  ;;  %v2037_v56 = vmul.f32 %v1902_v39, %v5879_v29  ;;  %v1291_v14 = vsub.f32 1.0, %v1290_v11  ;;  %v1320_v33 = vmul.f32 %v5378_v13, %v5304_v10 }
 0x1bd   : > { %2131 = vmatpush.bf16.msra.mxu1 %v2075_v59  ;;  %v1276_v60 = vsub.f32 1.0, %v1275_v52  ;;  %v2073_v2 = vpack.c.bf16 %v2036_v35, %v2035_v17  ;;  %v2081_v45 = vunpack.c.l.b16 %v5376_v62  ;;  %v1268_v50 = vand.u32 2147483647, %v5154_v40 }
 0x1be   : > { %2099 = vmatmul.bf16.vlgmr.msrb.gmra.mxu1 %v2083_v24  ;;  %v1283_v34 = vand.u32 2147483647, %v5200_v36  ;;  %v1321_v4 = vsub.f32 1.0, %v1320_v33  ;;  %v2074_v49 = vpack.c.bf16 %v2038_v42, %v2037_v56  ;;  %v1262_v12 = vmul.f32 %v5244_v6, %v1261_v48  ;;  %v5887_v48 = vld [vmem:[#allocation21_spill] sm:$0xff] }
 0x1bf   : > { %v1285_v3 = vand.u32 2147483648, %v5200_v36  ;;  %v1307_v38 = vmul.f32 %v5306_v53, %v1306_v61  ;;  %v2085_v20 = vpack.c.b16 %v2081_v45, %v2081_v45  ;;  %vm1280_vm0 = vweird.f32 %v5331_v58 }
 0x1c0   : > { %v1292_v9 = vmul.f32 %v5319_v37, %v1291_v14  ;;  %vm1294_vm9 = vweird.f32 %v5214_v55  ;;  %v1322_v21 = vmul.f32 %v5378_v13, %v1321_v4  ;;  %vm1265_vm1 = vweird.f32 %v5244_v6 }
 0x1c1   : > { %v2868_v1 = vpop.eup %2867  ;;  %2132 = vmatpush.bf16.msra.mxu1 %v2074_v49  ;;  %v1277_v22 = vmul.f32 %v5331_v58, %v1276_v60  ;;  %vm1279_vm12 = vweird.f32 %v5200_v36  ;;  %vm1295_vm6 = vweird.f32 %v5319_v37  ;;  %vm1325_vm7 = vweird.f32 %v5378_v13  ;;  %2125 = vmatmul.bf16.vlgmr.msrb.gmra.mxu3 %v2085_v20  ;;  %v5891_v49 = vld [vmem:[#allocation6_spill] sm:$0xff] }
 0x1c2   : > { %v1335_v51 = vmul.f32 %v2868_v1, %v5360_v31  ;;  %vm1309_vm2 = vweird.f32 %v5194_v41  ;;  %vm1310_vm4 = vweird.f32 %v5306_v53  ;;  %v1323_v54 = vadd.f32 %v5378_v13, %v1322_v21  ;;  %vm5437_vm11 = vmor %vm1294_vm9, %vm1295_vm6 }
 0x1c3   : > { %v1330_v47 = vand.u32 2147483648, %v5304_v10  ;;  %vm1264_vm15 = vweird.f32 %v5154_v40  ;;  %v1308_v32 = vadd.f32 %v5306_v53, %v1307_v38  ;;  %vm1324_vm10 = vweird.f32 %v5304_v10  ;;  %vm5429_vm3 = vmor %vm1309_vm2, %vm1310_vm4 }
 0x1c4   : > { %v1328_v19 = vand.u32 2147483647, %v5304_v10  ;;  %v1336_v25 = vsub.f32 1.0, %v1335_v51  ;;  %v1293_v43 = vadd.f32 %v5319_v37, %v1292_v9  ;;  %v1313_v15 = vand.u32 2147483647, %v5194_v41  ;;  %vm5413_vm5 = vmor %vm1324_vm10, %vm1325_vm7  ;;  %v5895_v51 = vld [vmem:[#allocation17_spill] sm:$0xff] }
 0x1c5   : > { %v1315_v26 = vand.u32 2147483648, %v5194_v41  ;;  %v1345_v8 = vand.u32 2147483648, %v5360_v31  ;;  %2133 = vmatpush.bf16.msra.mxu1 %v2073_v2  ;;  %v1327_v10 = vsel %vm5413_vm5, %v5378_v13, %v1323_v54  ;;  %vm1340_vm14 = vweird.f32 %v2868_v1  ;;  %vm5458_vm2 = vmor %vm1279_vm12, %vm1280_vm0 }
 0x1c6   : > { %v1337_v16 = vmul.f32 %v2868_v1, %v1336_v25  ;;  %v1343_v35 = vand.u32 2147483647, %v5360_v31  ;;  %v1278_v39 = vadd.f32 %v5331_v58, %v1277_v22  ;;  %v1298_v52 = vand.u32 2147483647, %v5214_v55  ;;  %vm1266_vm0 = vmor %vm1264_vm15, %vm1265_vm1  ;;  %v5894_v22 = vld [vmem:[#allocation22_spill] sm:$0xff] }
 0x1c7   : > { %v1300_v28 = vand.u32 2147483648, %v5214_v55  ;;  %v1331_v57 = vor.u32 1.1754944e-38, %v1330_v47  ;;  %v1312_v42 = vsel %vm5429_vm3, %v5306_v53, %v1308_v32  ;;  %vm1329_vm13 = vcmp.eq.f32.partialorder %v1328_v19, 8.507059e+37  ;;  %v5886_v55 = vld [vmem:[#allocation20_spill] sm:$0xff] }
 0x1c8   : > { %v1338_v59 = vadd.f32 %v2868_v1, %v1337_v16  ;;  %vm1339_vm8 = vweird.f32 %v5360_v31  ;;  %v1263_v41 = vadd.f32 %v5244_v6, %v1262_v12  ;;  %v1316_v13 = vor.u32 1.1754944e-38, %v1315_v26  ;;  %v5892_v12 = vld [vmem:[#allocation24_spill] sm:$0xff] }
 0x1c9   : > { %v1332_v27 = vsel %vm1329_vm13, %v1331_v57, %v1327_v10  ;;  %vm1341_vm7 = vmor %vm1339_vm8, %vm1340_vm14  ;;  %v1346_v17 = vor.u32 1.1754944e-38, %v1345_v8  ;;  %v5888_v61 = vpack.c.bf16 %v5886_v55, %v5887_v48  ;;  %v1297_v24 = vsel %vm5437_vm11, %v5319_v37, %v1293_v43  ;;  %v5898_v47 = vld [vmem:[#allocation12_spill] sm:$0xff] }
 0x1ca   : > { %vm1314_vm9 = vcmp.eq.f32.partialorder %v1313_v15, 8.507059e+37  ;;  %v1342_v53 = vsel %vm1341_vm7, %v2868_v1, %v1338_v59  ;;  %vm1344_vm6 = vcmp.eq.f32.partialorder %v1343_v35, 8.507059e+37  ;;  %v1270_v31 = vand.u32 2147483648, %v5154_v40  ;;  %v2563_v19 = vld [vmem:[%s5544_s4 + $0x8] sm:$0xff]  ;;  %v2562_v15 = vld [vmem:[%s5544_s4] sm:$0xff] }
 0x1cb   : > { %2134 = vmatpush.bf16.msra.mxu1 %v5888_v61  ;;  %v1301_v56 = vor.u32 1.1754944e-38, %v1300_v28  ;;  %v1317_v14 = vsel %vm1314_vm9, %v1316_v13, %v1312_v42  ;;  %v1347_v33 = vsel %vm1344_vm6, %v1346_v17, %v1342_v53  ;;  %v1282_v37 = vsel %vm5458_vm2, %v5331_v58, %v1278_v39 }
 0x1cc   : > { %vm1299_vm4 = vcmp.eq.f32.partialorder %v1298_v52, 8.507059e+37  ;;  %v1999_v60 = vmul.f32 %v1332_v27, %v5157_v0  ;;  %v2000_v2 = vmul.f32 %v1347_v33, %v5227_v44  ;;  %v1286_v45 = vor.u32 1.1754944e-38, %v1285_v3 }
 0x1cd   : > { %v1302_v4 = vsel %vm1299_vm4, %v1301_v56, %v1297_v24  ;;  %v5893_v38 = vpack.c.bf16 %v5891_v49, %v5892_v12  ;;  %v1267_v58 = vsel %vm1266_vm0, %v5244_v6, %v1263_v41  ;;  %vm1284_vm12 = vcmp.eq.f32.partialorder %v1283_v34, 8.507059e+37 }
 0x1ce   : > { %v1998_v0 = vmul.f32 %v1317_v14, %v5076_v30  ;;  %v2055_v44 = vpack.c.bf16 %v2000_v2, %v1999_v60  ;;  %v1271_v20 = vor.u32 1.1754944e-38, %v1270_v31  ;;  %v1287_v1 = vsel %vm1284_vm12, %v1286_v45, %v1282_v37 }
 0x1cf   : > { %2135 = vmatpush.bf16.msra.mxu1 %v5893_v38  ;;  %vm1269_vm1 = vcmp.eq.f32.partialorder %v1268_v50, 8.507059e+37  ;;  %v1997_v3 = vmul.f32 %v1302_v4, %v5083_v46  ;;  %v2082_v9 = vunpack.c.h.b16 %v5376_v62  ;;  %v5896_v6 = vpack.c.bf16 %v5894_v22, %v5895_v51  ;;  %v5897_v50 = vld [vmem:[#allocation15_spill] sm:$0xff] }
 0x1d0   : > { %2109 = vmatpush.bf16.msrb.mxu2 %v2055_v44  ;;  %v1272_v21 = vsel %vm1269_vm1, %v1271_v20, %v1267_v58  ;;  %v1996_v36 = vmul.f32 %v1287_v1, %v5064_v23  ;;  %v2080_v30 = vunpack.c.h.b16 %v5355_v63  ;;  %v5899_v46 = vpack.c.bf16 %v5897_v50, %v5898_v47  ;;  %v2565_v23 = vld [vmem:[%s5544_s4 + $0x18] sm:$0xff] }
 0x1d1   : > { %v2054_v34 = vpack.c.bf16 %v1998_v0, %v1997_v3  ;;  %v1995_v54 = vmul.f32 %v1272_v21, %v5021_v18  ;;  %v2086_v40 = vpack.c.b16 %v2082_v9, %v2082_v9  ;;  %v2564_v18 = vld [vmem:[%s5544_s4 + $0x10] sm:$0xff]  ;;  %vm2180_vm15 = vcmask 523264  }
 0x1d2   : > { %v2084_v62 = vpack.c.b16 %v2080_v30, %v2080_v30 }
 0x1d3   : > { %2136 = vmatpush.bf16.msra.mxu1 %v5896_v6  ;;  %v2053_v32 = vpack.c.bf16 %v1996_v36, %v1995_v54 }
 0x1d4   : > { %2110 = vmatpush.bf16.msrb.mxu2 %v2054_v34 }
 0x1d7   : > { %2137 = vmatpush.bf16.msra.mxu1 %v5899_v46 }
 0x1d8   : > { %2111 = vmatpush.bf16.msrb.mxu2 %v2053_v32 }
 0x1da   : > { %2138 = vmatmul.bf16.vlgmr.msra.gmra.mxu1 %v2086_v40 }
 0x1db   : > { %2112 = vmatmul.bf16.vlgmr.msrb.gmra.mxu2 %v2084_v62 }
 0x1dc   : > { %2188 = vmatpush.bf16.msra.mxu2 %v2565_v23 }
 0x1e0   : > { %2189 = vmatpush.bf16.msra.mxu2 %v2564_v18 }
 0x1e4   : > { %2190 = vmatpush.bf16.msra.mxu2 %v2563_v19 }
 0x1e8   : > { %2191 = vmatpush.bf16.msra.mxu2 %v2562_v15 }
 0x23b   : > { %v2100_v63 = vpop.f32.mrf.mxu1 }
 0x243   : > { %v2102_v25 = vpop.f32.mrf.mxu1 }
 0x244   : > { %v2126_v43 = vpop.f32.mrf.mxu3 }
 0x24c   : > { %v2128_v26 = vpop.f32.mrf.mxu3 }
 0x257   : > { %v2139_v11 = vpop.f32.mrf.mxu1 }
 0x25e   : > { %v2113_v10 = vpop.f32.mrf.mxu2 }
 0x25f   : > { %v2141_v8 = vpop.f32.mrf.mxu1  ;;  %v2114_v16 = vadd.f32 %v2113_v10, %v2100_v63 }
 0x261   : > { %v2127_v35 = vadd.f32 %v2126_v43, %v2114_v16 }
 0x263   : > { %v2140_v39 = vadd.f32 %v2139_v11, %v2127_v35 }
 0x265   : > { %v2143_v52 = vpack.c.bf16 %v2140_v39, %v2140_v39 }
 0x266   : > { %v2115_v28 = vpop.f32.mrf.mxu2 }
 0x267   : > { %2524 = vmatmul.msk.bf16.vlgmr.msra.gmra.mxu2 %vm2180_vm15, %v2143_v52 }
 0x2ea   : > { %v2193_v57 = vpop.f32.mrf.mxu2 }
 0x2eb   : > { %v2194_v7 = vadd.f32 %v2612_v5, %v2193_v57 }
 0x2ed   : > { %2197 = vst [vmem:[%s245_s14] sm:$0xff] %v2194_v7 }
 0x2ee   : > { %2898 = shalt.err (!%p2895_p3)
}
 0x2ef   : > { %2572 = dma.vmem_to_hbm [thread:$0]  (%p3008_p5), %s2212_s15, 128, %s2214_s16, %s2199_s17  }
 0x2f2   : > { %v2195_v42 = vpop.f32.mrf.mxu2 }
 0x2f3 PF: > { %p2578_p4 = scmp.ge.s32.totalorder %s2933_s24, 2  ;;  %s2225_s26 = sand.u32 1, %s2921_s21  }
 0x2f4   : > { %s2226_s10 = scalar_lea.sflag [#allocation3], %s2225_s26 }
 0x2f5   : > { %p2575_p7 = pnand %p2578_p4, %p3012_p6 }
 0x2f7   : > { %p2576_p8 = pneg %p2575_p7 }
 0x2f9   : > { %2916 = dma.done.wait (%p2576_p8), %s2226_s10, 128  }
 0x2fa   : > { %2918 = vsyncadd (%p2576_p8), %s2226_s10, 4294967168  ;;  %p16_p9 = scmp.ge.s32.totalorder %s2995_s27, 4   ;;  %s5900_s21 = smov %s2925_s22 }
 0x2fb   : > { %s5901_s22 = smov %s2929_s23  ;;  %s5902_s23 = smov %s3006_s30 }
 0x2fc   : > { %s5903_s24 = smov %s2995_s27  ;;  %18 = sbr.rel (!%p16_p9) target bundleno = 3 (0x3), region = 79 }
 0x301   :  { %2232 = vsyncpa [#allocation3], 1 }
 0x302   :  { %2234 = vsyncpa [#allocation3 + $0x1], 1 }

</bundles_post_ra>
